<compile_context>
chip_gen: v7x
topology: tpu7x:2x2x1
jax: 0.10.0
libtpu: 0.0.40
codegen_flags: <defaults>
</compile_context>

<pallas_src>
import functools

import jax
import jax.numpy as jnp
from jax.experimental import pallas as pl
from jax.experimental.pallas import tpu as pltpu


# ----------------------------------------------------------------------------
# 1. Embedding gather: batched manual row-DMA gather (scalar prefetch + pl.ANY)
# ----------------------------------------------------------------------------
def _embed_kernel(ids_ref, emb_hbm, out_ref, sems, *, tok, window):
    """Gather `tok` embedding rows per grid step, straight into out_ref.

    ids_ref : SMEM scalar-prefetch int32[(padded_tokens,)]
    emb_hbm : HBM ref to the full [V, D] table (no auto-DMA)
    out_ref : VMEM output block (tok, D) — DMA destination, no scratch copy
    sems    : rotating DMA semaphore window (window,)
    """
    base = pl.program_id(0) * tok

    # Hoist every scalar id read before any DMA wait (keeps SMEM sst->sld
    # forwarding intact; waits would otherwise break it).
    rows = [ids_ref[base + j] for j in range(tok)]

    def dma(j):
        # Same (row -> out row j) slices used for both .start() and .wait(),
        # so semaphore byte accounting always matches the issued copy.
        return pltpu.make_async_copy(
            emb_hbm.at[pl.ds(rows[j], 1), :],
            out_ref.at[pl.ds(j, 1), :],
            sems.at[j % window],
        )

    # Keep up to `window` row DMAs in flight; free a slot just before reuse.
    for j in range(tok):
        if j >= window:
            dma(j - window).wait()
        dma(j).start()
    for j in range(max(0, tok - window), tok):
        dma(j).wait()


def _min_sublanes(dtype):
    # Whole packed tiles: 8 sublanes for 32-bit, 16 for 16-bit, 32 for 8-bit.
    return max(8, 32 // jnp.dtype(dtype).itemsize)


def _pick_tok(n_tokens, dtype, feat_dim, *, target=128, vmem_budget=8 << 20):
    """Largest multiple of the sublane packing that divides n_tokens, is
    <= target, and keeps the double-buffered (tok, D) output within budget."""
    min_sub = _min_sublanes(dtype)
    itemsize = jnp.dtype(dtype).itemsize
    cap = min(target, max(min_sub, vmem_budget // (2 * feat_dim * itemsize)))
    cap = max(min_sub, (cap // min_sub) * min_sub)

    best = None
    t = min_sub
    limit = min(cap, n_tokens)
    while t <= limit:
        if n_tokens % t == 0:
            best = t
        t += min_sub
    if best is not None:
        return best
    # No divisor found (n_tokens not a multiple of the packing): pad instead.
    return min(cap, ((n_tokens + min_sub - 1) // min_sub) * min_sub)


def embedding_lookup(input_ids, emb_table, *, tok=None, window=16):
    """input_ids: [B, S] int32, emb_table: [V, D] -> [B, S, D]."""
    B, S = input_ids.shape
    V, D = emb_table.shape
    N = B * S

    if tok is None:
        tok = _pick_tok(N, emb_table.dtype, D)
    padded = ((N + tok - 1) // tok) * tok
    window = max(1, min(window, tok))

    flat_ids = input_ids.reshape(-1).astype(jnp.int32)
    if padded != N:
        # Tail tokens gather row 0 and are discarded; normally avoided because
        # tok is chosen to divide B*S (so no out[:N] activation copy either).
        flat_ids = jnp.pad(flat_ids, (0, padded - N))

    # TODO(synk): for B*S >~ 256K tokens, block the id prefetch instead of
    # scalar-prefetching the whole flat id array into SMEM.
    grid_spec = pltpu.PrefetchScalarGridSpec(
        num_scalar_prefetch=1,
        grid=(padded // tok,),
        in_specs=[
            # Embedding table stays in HBM; rows are DMA'd manually per id.
            pl.BlockSpec(memory_space=pl.ANY),
        ],
        out_specs=pl.BlockSpec((tok, D), lambda i, ids: (i, 0)),
        scratch_shapes=[
            pltpu.SemaphoreType.DMA((window,)),
        ],
    )
    out = pl.pallas_call(
        functools.partial(_embed_kernel, tok=tok, window=window),
        grid_spec=grid_spec,
        out_shape=jax.ShapeDtypeStruct((padded, D), emb_table.dtype),
        compiler_params=pltpu.CompilerParams(
            # Tokens are independent & outputs disjoint -> shard across TCs (v7x).
            dimension_semantics=("parallel",)),
    )(flat_ids, emb_table)

    if padded != N:
        out = out[:N]
    return out.reshape(B, S, D)


# ----------------------------------------------------------------------------
# 2. RoPE frequency table kernel (precompute_freqs_cis) — cached constant
# ----------------------------------------------------------------------------
def _freqs_kernel(cos_ref, sin_ref, *, head_dim, theta, train_pi):
    L, H = cos_ref.shape  # H == head_dim // 2
    # inv_freq computed once as a (1, H) row (H transcendentals, not L*H):
    # inv_freq[k] = theta ** (-(2k)/head_dim)
    k = jax.lax.broadcasted_iota(jnp.float32, (1, H), 1)
    inv_freq = jnp.exp(-(2.0 * k / jnp.float32(head_dim)) *
                       jnp.log(jnp.float32(theta)))
    t = jax.lax.broadcasted_iota(jnp.float32, (L, 1), 0)
    if train_pi and train_pi != 1:
        t = t / jnp.float32(train_pi)  # position interpolation
    angle = t * inv_freq               # (L, 1) * (1, H) -> (L, H)
    cos_ref[...] = jnp.cos(angle)
    sin_ref[...] = jnp.sin(angle)


@functools.lru_cache(maxsize=None)
def precompute_freqs_cis(head_dim, max_len, theta=10000.0, train_pi=1):
    """Returns (cos, sin), each float32 [max_len, head_dim//2].

    Real pair instead of complex64 (torch.polar equivalent is cos + 1j*sin);
    downstream RoPE apply consumes cos/sin directly on the VPU.
    Cached: data-independent constant, computed once per config.
    Lane-padding to 128 is possible but pointless for a one-time constant.
    """
    H = head_dim // 2
    cos, sin = pl.pallas_call(
        functools.partial(_freqs_kernel, head_dim=head_dim, theta=theta,
                          train_pi=train_pi),
        out_shape=(
            jax.ShapeDtypeStruct((max_len, H), jnp.float32),
            jax.ShapeDtypeStruct((max_len, H), jnp.float32),
        ),
    )()
    return cos, sin


# ----------------------------------------------------------------------------
# 3. Causal attention mask kernel (LLaMaTrainModel.get_masks) — cached constant
# ----------------------------------------------------------------------------
def _mask_kernel(mask_ref):
    TM, S = mask_ref.shape
    base = pl.program_id(0) * TM
    row = base + jax.lax.broadcasted_iota(jnp.int32, (TM, S), 0)
    col = jax.lax.broadcasted_iota(jnp.int32, (TM, S), 1)
    # -inf additive mask is valid for f32/bf16/f16 (would saturate for fp8).
    mask_ref[...] = jnp.where(col > row, -jnp.inf, 0.0).astype(mask_ref.dtype)


def _pick_row_tile(seq_len, itemsize, *, max_tile=512, budget_bytes=8 << 20):
    """Row tile such that the double-buffered (tm, S) block stays in budget
    (keeps the kernel safe on v7x's smaller VMEM) and tm divides seq_len."""
    cap = budget_bytes // max(1, 2 * seq_len * itemsize)
    cap = max(8, min(max_tile, cap))
    for t in (512, 256, 128, 64, 32, 16, 8):
        if t <= cap and seq_len % t == 0:
            return t
    return seq_len


@functools.lru_cache(maxsize=None)
def get_masks(seq_len, dtype=jnp.float32):
    """Additive causal mask [1, 1, S, S]; tiled over rows so each VMEM block is
    (tm, S) instead of the full (S, S). Cached per (seq_len, dtype).

    TODO(synk): for long sequences the mask should not be materialized at all;
    fuse the causal compare into the attention kernel instead.
    """
    itemsize = jnp.dtype(dtype).itemsize
    tm = _pick_row_tile(seq_len, itemsize)
    mask = pl.pallas_call(
        _mask_kernel,
        grid=(seq_len // tm,),
        out_specs=pl.BlockSpec((tm, seq_len), lambda i: (i, 0)),
        out_shape=jax.ShapeDtypeStruct((seq_len, seq_len), dtype),
        compiler_params=pltpu.CompilerParams(
            dimension_semantics=("parallel",)),
    )()
    return mask.reshape(1, 1, seq_len, seq_len)


# ----------------------------------------------------------------------------
# Full EmbeddingPipelineLayer forward
# ----------------------------------------------------------------------------
def embedding_pipeline_layer(input_ids, labels, emb_table, *, head_dim,
                             max_len, rope_theta=10000.0, train_pi=1):
    hidden_states = embedding_lookup(input_ids, emb_table)
    # Constants (cached across steps): mask in the attention dtype, RoPE table.
    attention_mask = get_masks(int(input_ids.shape[1]),
                               dtype=hidden_states.dtype)
    freqs_cos, freqs_sin = precompute_freqs_cis(head_dim, max_len,
                                                theta=rope_theta,
                                                train_pi=train_pi)
    # TODO(synk): requires_grad_() has no JAX equivalent (gradients come from
    # transforms, not tensors); no-op here.
    return hidden_states, (freqs_cos, freqs_sin), attention_mask, labels


if __name__ == "__main__":
    # Small synthetic config consistent with the module's __init__:
    VOCAB = 128
    HIDDEN = 128      # lane-dense feature dim
    HEAD_DIM = 64
    MAX_LEN = 32
    B, S = 2, 16

    key = jax.random.PRNGKey(0)
    k_emb, k_ids, k_lbl = jax.random.split(key, 3)

    emb_table = jax.random.normal(k_emb, (VOCAB, HIDDEN), dtype=jnp.float32)
    input_ids = jax.random.randint(k_ids, (B, S), 0, VOCAB, dtype=jnp.int32)
    labels = jax.random.randint(k_lbl, (B, S), 0, VOCAB, dtype=jnp.int32)

    out = jax.block_until_ready(
        embedding_pipeline_layer(
            input_ids, labels, emb_table,
            head_dim=HEAD_DIM, max_len=MAX_LEN, rope_theta=10000.0,
            train_pi=1))
    hidden_states, (freqs_cos, freqs_sin), attention_mask, labels_out = out

    # Lightweight correctness checks against pure-JAX references.
    ref_hidden = emb_table[input_ids]
    assert hidden_states.shape == (B, S, HIDDEN)
    assert jnp.allclose(hidden_states, ref_hidden, atol=1e-6)

    t = jnp.arange(MAX_LEN, dtype=jnp.float32)
    inv_freq = 1.0 / (10000.0 ** (jnp.arange(0, HEAD_DIM, 2,
                                             dtype=jnp.float32) / HEAD_DIM))
    ref_freqs = jnp.exp(1j * jnp.outer(t, inv_freq))
    freqs_cis = freqs_cos + 1j * freqs_sin   # == torch.polar(ones, angle)
    assert freqs_cis.shape == (MAX_LEN, HEAD_DIM // 2)
    assert jnp.allclose(freqs_cis, ref_freqs, atol=1e-5)

    ref_mask = jnp.where(
        jnp.arange(S)[None, :] > jnp.arange(S)[:, None], -jnp.inf, 0.0
    )[None, None].astype(jnp.float32)
    assert attention_mask.shape == (1, 1, S, S)
    assert jnp.array_equal(attention_mask, ref_mask)
    assert jnp.array_equal(labels_out, labels)

    print("KERNEL_OK")
</pallas_src>

<mosaic_0001>
module attributes {stable_mosaic.version = 11 : i64} {
  func.func @_embed_kernel(%arg0: i32, %arg1: memref<32xi32, #tpu.memory_space<smem>>, %arg2: memref<128x128xf32, #tpu.memory_space<any>>, %arg3: memref<32x128xf32, #tpu.memory_space<vmem>>, %arg4: memref<16x!tpu.dma_semaphore, #tpu.memory_space<semaphore_mem>>) attributes {dimension_semantics = [#tpu.dimension_semantics<parallel>], iteration_bounds = array<i64: 1>, scalar_prefetch = 1 : i64, scratch_operands = 1 : i64, tpu.core_type = #tpu.core_type<tc>, window_params = [{}, {transform_indices = @transform_1, window_bounds = array<i64: 32, 128>}]} {
    %c32_i32 = arith.constant 32 : i32
    %0 = arith.muli %arg0, %c32_i32 : i32
    %c0_i32 = arith.constant 0 : i32
    %1 = arith.addi %0, %c0_i32 : i32
    %2 = arith.index_cast %1 : i32 to index
    %3 = memref.load %arg1[%2] : memref<32xi32, #tpu.memory_space<smem>>
    %c1_i32 = arith.constant 1 : i32
    %4 = arith.addi %0, %c1_i32 : i32
    %5 = arith.index_cast %4 : i32 to index
    %6 = memref.load %arg1[%5] : memref<32xi32, #tpu.memory_space<smem>>
    %c2_i32 = arith.constant 2 : i32
    %7 = arith.addi %0, %c2_i32 : i32
    %8 = arith.index_cast %7 : i32 to index
    %9 = memref.load %arg1[%8] : memref<32xi32, #tpu.memory_space<smem>>
    %c3_i32 = arith.constant 3 : i32
    %10 = arith.addi %0, %c3_i32 : i32
    %11 = arith.index_cast %10 : i32 to index
    %12 = memref.load %arg1[%11] : memref<32xi32, #tpu.memory_space<smem>>
    %c4_i32 = arith.constant 4 : i32
    %13 = arith.addi %0, %c4_i32 : i32
    %14 = arith.index_cast %13 : i32 to index
    %15 = memref.load %arg1[%14] : memref<32xi32, #tpu.memory_space<smem>>
    %c5_i32 = arith.constant 5 : i32
    %16 = arith.addi %0, %c5_i32 : i32
    %17 = arith.index_cast %16 : i32 to index
    %18 = memref.load %arg1[%17] : memref<32xi32, #tpu.memory_space<smem>>
    %c6_i32 = arith.constant 6 : i32
    %19 = arith.addi %0, %c6_i32 : i32
    %20 = arith.index_cast %19 : i32 to index
    %21 = memref.load %arg1[%20] : memref<32xi32, #tpu.memory_space<smem>>
    %c7_i32 = arith.constant 7 : i32
    %22 = arith.addi %0, %c7_i32 : i32
    %23 = arith.index_cast %22 : i32 to index
    %24 = memref.load %arg1[%23] : memref<32xi32, #tpu.memory_space<smem>>
    %c8_i32 = arith.constant 8 : i32
    %25 = arith.addi %0, %c8_i32 : i32
    %26 = arith.index_cast %25 : i32 to index
    %27 = memref.load %arg1[%26] : memref<32xi32, #tpu.memory_space<smem>>
    %c9_i32 = arith.constant 9 : i32
    %28 = arith.addi %0, %c9_i32 : i32
    %29 = arith.index_cast %28 : i32 to index
    %30 = memref.load %arg1[%29] : memref<32xi32, #tpu.memory_space<smem>>
    %c10_i32 = arith.constant 10 : i32
    %31 = arith.addi %0, %c10_i32 : i32
    %32 = arith.index_cast %31 : i32 to index
    %33 = memref.load %arg1[%32] : memref<32xi32, #tpu.memory_space<smem>>
    %c11_i32 = arith.constant 11 : i32
    %34 = arith.addi %0, %c11_i32 : i32
    %35 = arith.index_cast %34 : i32 to index
    %36 = memref.load %arg1[%35] : memref<32xi32, #tpu.memory_space<smem>>
    %c12_i32 = arith.constant 12 : i32
    %37 = arith.addi %0, %c12_i32 : i32
    %38 = arith.index_cast %37 : i32 to index
    %39 = memref.load %arg1[%38] : memref<32xi32, #tpu.memory_space<smem>>
    %c13_i32 = arith.constant 13 : i32
    %40 = arith.addi %0, %c13_i32 : i32
    %41 = arith.index_cast %40 : i32 to index
    %42 = memref.load %arg1[%41] : memref<32xi32, #tpu.memory_space<smem>>
    %c14_i32 = arith.constant 14 : i32
    %43 = arith.addi %0, %c14_i32 : i32
    %44 = arith.index_cast %43 : i32 to index
    %45 = memref.load %arg1[%44] : memref<32xi32, #tpu.memory_space<smem>>
    %c15_i32 = arith.constant 15 : i32
    %46 = arith.addi %0, %c15_i32 : i32
    %47 = arith.index_cast %46 : i32 to index
    %48 = memref.load %arg1[%47] : memref<32xi32, #tpu.memory_space<smem>>
    %c16_i32 = arith.constant 16 : i32
    %49 = arith.addi %0, %c16_i32 : i32
    %50 = arith.index_cast %49 : i32 to index
    %51 = memref.load %arg1[%50] : memref<32xi32, #tpu.memory_space<smem>>
    %c17_i32 = arith.constant 17 : i32
    %52 = arith.addi %0, %c17_i32 : i32
    %53 = arith.index_cast %52 : i32 to index
    %54 = memref.load %arg1[%53] : memref<32xi32, #tpu.memory_space<smem>>
    %c18_i32 = arith.constant 18 : i32
    %55 = arith.addi %0, %c18_i32 : i32
    %56 = arith.index_cast %55 : i32 to index
    %57 = memref.load %arg1[%56] : memref<32xi32, #tpu.memory_space<smem>>
    %c19_i32 = arith.constant 19 : i32
    %58 = arith.addi %0, %c19_i32 : i32
    %59 = arith.index_cast %58 : i32 to index
    %60 = memref.load %arg1[%59] : memref<32xi32, #tpu.memory_space<smem>>
    %c20_i32 = arith.constant 20 : i32
    %61 = arith.addi %0, %c20_i32 : i32
    %62 = arith.index_cast %61 : i32 to index
    %63 = memref.load %arg1[%62] : memref<32xi32, #tpu.memory_space<smem>>
    %c21_i32 = arith.constant 21 : i32
    %64 = arith.addi %0, %c21_i32 : i32
    %65 = arith.index_cast %64 : i32 to index
    %66 = memref.load %arg1[%65] : memref<32xi32, #tpu.memory_space<smem>>
    %c22_i32 = arith.constant 22 : i32
    %67 = arith.addi %0, %c22_i32 : i32
    %68 = arith.index_cast %67 : i32 to index
    %69 = memref.load %arg1[%68] : memref<32xi32, #tpu.memory_space<smem>>
    %c23_i32 = arith.constant 23 : i32
    %70 = arith.addi %0, %c23_i32 : i32
    %71 = arith.index_cast %70 : i32 to index
    %72 = memref.load %arg1[%71] : memref<32xi32, #tpu.memory_space<smem>>
    %c24_i32 = arith.constant 24 : i32
    %73 = arith.addi %0, %c24_i32 : i32
    %74 = arith.index_cast %73 : i32 to index
    %75 = memref.load %arg1[%74] : memref<32xi32, #tpu.memory_space<smem>>
    %c25_i32 = arith.constant 25 : i32
    %76 = arith.addi %0, %c25_i32 : i32
    %77 = arith.index_cast %76 : i32 to index
    %78 = memref.load %arg1[%77] : memref<32xi32, #tpu.memory_space<smem>>
    %c26_i32 = arith.constant 26 : i32
    %79 = arith.addi %0, %c26_i32 : i32
    %80 = arith.index_cast %79 : i32 to index
    %81 = memref.load %arg1[%80] : memref<32xi32, #tpu.memory_space<smem>>
    %c27_i32 = arith.constant 27 : i32
    %82 = arith.addi %0, %c27_i32 : i32
    %83 = arith.index_cast %82 : i32 to index
    %84 = memref.load %arg1[%83] : memref<32xi32, #tpu.memory_space<smem>>
    %c28_i32 = arith.constant 28 : i32
    %85 = arith.addi %0, %c28_i32 : i32
    %86 = arith.index_cast %85 : i32 to index
    %87 = memref.load %arg1[%86] : memref<32xi32, #tpu.memory_space<smem>>
    %c29_i32 = arith.constant 29 : i32
    %88 = arith.addi %0, %c29_i32 : i32
    %89 = arith.index_cast %88 : i32 to index
    %90 = memref.load %arg1[%89] : memref<32xi32, #tpu.memory_space<smem>>
    %c30_i32 = arith.constant 30 : i32
    %91 = arith.addi %0, %c30_i32 : i32
    %92 = arith.index_cast %91 : i32 to index
    %93 = memref.load %arg1[%92] : memref<32xi32, #tpu.memory_space<smem>>
    %c31_i32 = arith.constant 31 : i32
    %94 = arith.addi %0, %c31_i32 : i32
    %95 = arith.index_cast %94 : i32 to index
    %96 = memref.load %arg1[%95] : memref<32xi32, #tpu.memory_space<smem>>
    %c0_i32_0 = arith.constant 0 : i32
    %c0_i32_1 = arith.constant 0 : i32
    %97 = tpu.memref_slice %arg2[%3, %c0_i32_1] : memref<128x128xf32, #tpu.memory_space<any>> -> memref<1x128xf32, #tpu.memory_space<any>>
    %c0_i32_2 = arith.constant 0 : i32
    %c0_i32_3 = arith.constant 0 : i32
    %98 = tpu.memref_slice %arg3[%c0_i32_2, %c0_i32_3] : memref<32x128xf32, #tpu.memory_space<vmem>> -> memref<1x128xf32, #tpu.memory_space<vmem>>
    %99 = tpu.memref_slice %arg4[%c0_i32_0] : memref<16x!tpu.dma_semaphore, #tpu.memory_space<semaphore_mem>> -> memref<1x!tpu.dma_semaphore, #tpu.memory_space<semaphore_mem>>
    %100 = tpu.memref_squeeze %99 : memref<1x!tpu.dma_semaphore, #tpu.memory_space<semaphore_mem>> -> memref<!tpu.dma_semaphore, #tpu.memory_space<semaphore_mem>>
    tpu.enqueue_dma source(%97 : memref<1x128xf32, #tpu.memory_space<any>>) target(%98 : memref<1x128xf32, #tpu.memory_space<vmem>>) target_semaphore(%100 : memref<!tpu.dma_semaphore, #tpu.memory_space<semaphore_mem>>)
    %c1_i32_4 = arith.constant 1 : i32
    %c0_i32_5 = arith.constant 0 : i32
    %101 = tpu.memref_slice %arg2[%6, %c0_i32_5] : memref<128x128xf32, #tpu.memory_space<any>> -> memref<1x128xf32, #tpu.memory_space<any>>
    %c1_i32_6 = arith.constant 1 : i32
    %c0_i32_7 = arith.constant 0 : i32
    %102 = tpu.memref_slice %arg3[%c1_i32_6, %c0_i32_7] : memref<32x128xf32, #tpu.memory_space<vmem>> -> memref<1x128xf32, #tpu.memory_space<vmem>>
    %103 = tpu.memref_slice %arg4[%c1_i32_4] : memref<16x!tpu.dma_semaphore, #tpu.memory_space<semaphore_mem>> -> memref<1x!tpu.dma_semaphore, #tpu.memory_space<semaphore_mem>>
    %104 = tpu.memref_squeeze %103 : memref<1x!tpu.dma_semaphore, #tpu.memory_space<semaphore_mem>> -> memref<!tpu.dma_semaphore, #tpu.memory_space<semaphore_mem>>
    tpu.enqueue_dma source(%101 : memref<1x128xf32, #tpu.memory_space<any>>) target(%102 : memref<1x128xf32, #tpu.memory_space<vmem>>) target_semaphore(%104 : memref<!tpu.dma_semaphore, #tpu.memory_space<semaphore_mem>>)
    %c2_i32_8 = arith.constant 2 : i32
    %c0_i32_9 = arith.constant 0 : i32
    %105 = tpu.memref_slice %arg2[%9, %c0_i32_9] : memref<128x128xf32, #tpu.memory_space<any>> -> memref<1x128xf32, #tpu.memory_space<any>>
    %c2_i32_10 = arith.constant 2 : i32
    %c0_i32_11 = arith.constant 0 : i32
    %106 = tpu.memref_slice %arg3[%c2_i32_10, %c0_i32_11] : memref<32x128xf32, #tpu.memory_space<vmem>> -> memref<1x128xf32, #tpu.memory_space<vmem>>
    %107 = tpu.memref_slice %arg4[%c2_i32_8] : memref<16x!tpu.dma_semaphore, #tpu.memory_space<semaphore_mem>> -> memref<1x!tpu.dma_semaphore, #tpu.memory_space<semaphore_mem>>
    %108 = tpu.memref_squeeze %107 : memref<1x!tpu.dma_semaphore, #tpu.memory_space<semaphore_mem>> -> memref<!tpu.dma_semaphore, #tpu.memory_space<semaphore_mem>>
    tpu.enqueue_dma source(%105 : memref<1x128xf32, #tpu.memory_space<any>>) target(%106 : memref<1x128xf32, #tpu.memory_space<vmem>>) target_semaphore(%108 : memref<!tpu.dma_semaphore, #tpu.memory_space<semaphore_mem>>)
    %c3_i32_12 = arith.constant 3 : i32
    %c0_i32_13 = arith.constant 0 : i32
    %109 = tpu.memref_slice %arg2[%12, %c0_i32_13] : memref<128x128xf32, #tpu.memory_space<any>> -> memref<1x128xf32, #tpu.memory_space<any>>
    %c3_i32_14 = arith.constant 3 : i32
    %c0_i32_15 = arith.constant 0 : i32
    %110 = tpu.memref_slice %arg3[%c3_i32_14, %c0_i32_15] : memref<32x128xf32, #tpu.memory_space<vmem>> -> memref<1x128xf32, #tpu.memory_space<vmem>>
    %111 = tpu.memref_slice %arg4[%c3_i32_12] : memref<16x!tpu.dma_semaphore, #tpu.memory_space<semaphore_mem>> -> memref<1x!tpu.dma_semaphore, #tpu.memory_space<semaphore_mem>>
    %112 = tpu.memref_squeeze %111 : memref<1x!tpu.dma_semaphore, #tpu.memory_space<semaphore_mem>> -> memref<!tpu.dma_semaphore, #tpu.memory_space<semaphore_mem>>
    tpu.enqueue_dma source(%109 : memref<1x128xf32, #tpu.memory_space<any>>) target(%110 : memref<1x128xf32, #tpu.memory_space<vmem>>) target_semaphore(%112 : memref<!tpu.dma_semaphore, #tpu.memory_space<semaphore_mem>>)
    %c4_i32_16 = arith.constant 4 : i32
    %c0_i32_17 = arith.constant 0 : i32
    %113 = tpu.memref_slice %arg2[%15, %c0_i32_17] : memref<128x128xf32, #tpu.memory_space<any>> -> memref<1x128xf32, #tpu.memory_space<any>>
    %c4_i32_18 = arith.constant 4 : i32
    %c0_i32_19 = arith.constant 0 : i32
    %114 = tpu.memref_slice %arg3[%c4_i32_18, %c0_i32_19] : memref<32x128xf32, #tpu.memory_space<vmem>> -> memref<1x128xf32, #tpu.memory_space<vmem>>
    %115 = tpu.memref_slice %arg4[%c4_i32_16] : memref<16x!tpu.dma_semaphore, #tpu.memory_space<semaphore_mem>> -> memref<1x!tpu.dma_semaphore, #tpu.memory_space<semaphore_mem>>
    %116 = tpu.memref_squeeze %115 : memref<1x!tpu.dma_semaphore, #tpu.memory_space<semaphore_mem>> -> memref<!tpu.dma_semaphore, #tpu.memory_space<semaphore_mem>>
    tpu.enqueue_dma source(%113 : memref<1x128xf32, #tpu.memory_space<any>>) target(%114 : memref<1x128xf32, #tpu.memory_space<vmem>>) target_semaphore(%116 : memref<!tpu.dma_semaphore, #tpu.memory_space<semaphore_mem>>)
    %c5_i32_20 = arith.constant 5 : i32
    %c0_i32_21 = arith.constant 0 : i32
    %117 = tpu.memref_slice %arg2[%18, %c0_i32_21] : memref<128x128xf32, #tpu.memory_space<any>> -> memref<1x128xf32, #tpu.memory_space<any>>
    %c5_i32_22 = arith.constant 5 : i32
    %c0_i32_23 = arith.constant 0 : i32
    %118 = tpu.memref_slice %arg3[%c5_i32_22, %c0_i32_23] : memref<32x128xf32, #tpu.memory_space<vmem>> -> memref<1x128xf32, #tpu.memory_space<vmem>>
    %119 = tpu.memref_slice %arg4[%c5_i32_20] : memref<16x!tpu.dma_semaphore, #tpu.memory_space<semaphore_mem>> -> memref<1x!tpu.dma_semaphore, #tpu.memory_space<semaphore_mem>>
    %120 = tpu.memref_squeeze %119 : memref<1x!tpu.dma_semaphore, #tpu.memory_space<semaphore_mem>> -> memref<!tpu.dma_semaphore, #tpu.memory_space<semaphore_mem>>
    tpu.enqueue_dma source(%117 : memref<1x128xf32, #tpu.memory_space<any>>) target(%118 : memref<1x128xf32, #tpu.memory_space<vmem>>) target_semaphore(%120 : memref<!tpu.dma_semaphore, #tpu.memory_space<semaphore_mem>>)
    %c6_i32_24 = arith.constant 6 : i32
    %c0_i32_25 = arith.constant 0 : i32
    %121 = tpu.memref_slice %arg2[%21, %c0_i32_25] : memref<128x128xf32, #tpu.memory_space<any>> -> memref<1x128xf32, #tpu.memory_space<any>>
    %c6_i32_26 = arith.constant 6 : i32
    %c0_i32_27 = arith.constant 0 : i32
    %122 = tpu.memref_slice %arg3[%c6_i32_26, %c0_i32_27] : memref<32x128xf32, #tpu.memory_space<vmem>> -> memref<1x128xf32, #tpu.memory_space<vmem>>
    %123 = tpu.memref_slice %arg4[%c6_i32_24] : memref<16x!tpu.dma_semaphore, #tpu.memory_space<semaphore_mem>> -> memref<1x!tpu.dma_semaphore, #tpu.memory_space<semaphore_mem>>
    %124 = tpu.memref_squeeze %123 : memref<1x!tpu.dma_semaphore, #tpu.memory_space<semaphore_mem>> -> memref<!tpu.dma_semaphore, #tpu.memory_space<semaphore_mem>>
    tpu.enqueue_dma source(%121 : memref<1x128xf32, #tpu.memory_space<any>>) target(%122 : memref<1x128xf32, #tpu.memory_space<vmem>>) target_semaphore(%124 : memref<!tpu.dma_semaphore, #tpu.memory_space<semaphore_mem>>)
    %c7_i32_28 = arith.constant 7 : i32
    %c0_i32_29 = arith.constant 0 : i32
    %125 = tpu.memref_slice %arg2[%24, %c0_i32_29] : memref<128x128xf32, #tpu.memory_space<any>> -> memref<1x128xf32, #tpu.memory_space<any>>
    %c7_i32_30 = arith.constant 7 : i32
    %c0_i32_31 = arith.constant 0 : i32
    %126 = tpu.memref_slice %arg3[%c7_i32_30, %c0_i32_31] : memref<32x128xf32, #tpu.memory_space<vmem>> -> memref<1x128xf32, #tpu.memory_space<vmem>>
    %127 = tpu.memref_slice %arg4[%c7_i32_28] : memref<16x!tpu.dma_semaphore, #tpu.memory_space<semaphore_mem>> -> memref<1x!tpu.dma_semaphore, #tpu.memory_space<semaphore_mem>>
    %128 = tpu.memref_squeeze %127 : memref<1x!tpu.dma_semaphore, #tpu.memory_space<semaphore_mem>> -> memref<!tpu.dma_semaphore, #tpu.memory_space<semaphore_mem>>
    tpu.enqueue_dma source(%125 : memref<1x128xf32, #tpu.memory_space<any>>) target(%126 : memref<1x128xf32, #tpu.memory_space<vmem>>) target_semaphore(%128 : memref<!tpu.dma_semaphore, #tpu.memory_space<semaphore_mem>>)
    %c8_i32_32 = arith.constant 8 : i32
    %c0_i32_33 = arith.constant 0 : i32
    %129 = tpu.memref_slice %arg2[%27, %c0_i32_33] : memref<128x128xf32, #tpu.memory_space<any>> -> memref<1x128xf32, #tpu.memory_space<any>>
    %c8_i32_34 = arith.constant 8 : i32
    %c0_i32_35 = arith.constant 0 : i32
    %130 = tpu.memref_slice %arg3[%c8_i32_34, %c0_i32_35] : memref<32x128xf32, #tpu.memory_space<vmem>> -> memref<1x128xf32, #tpu.memory_space<vmem>>
    %131 = tpu.memref_slice %arg4[%c8_i32_32] : memref<16x!tpu.dma_semaphore, #tpu.memory_space<semaphore_mem>> -> memref<1x!tpu.dma_semaphore, #tpu.memory_space<semaphore_mem>>
    %132 = tpu.memref_squeeze %131 : memref<1x!tpu.dma_semaphore, #tpu.memory_space<semaphore_mem>> -> memref<!tpu.dma_semaphore, #tpu.memory_space<semaphore_mem>>
    tpu.enqueue_dma source(%129 : memref<1x128xf32, #tpu.memory_space<any>>) target(%130 : memref<1x128xf32, #tpu.memory_space<vmem>>) target_semaphore(%132 : memref<!tpu.dma_semaphore, #tpu.memory_space<semaphore_mem>>)
    %c9_i32_36 = arith.constant 9 : i32
    %c0_i32_37 = arith.constant 0 : i32
    %133 = tpu.memref_slice %arg2[%30, %c0_i32_37] : memref<128x128xf32, #tpu.memory_space<any>> -> memref<1x128xf32, #tpu.memory_space<any>>
    %c9_i32_38 = arith.constant 9 : i32
    %c0_i32_39 = arith.constant 0 : i32
    %134 = tpu.memref_slice %arg3[%c9_i32_38, %c0_i32_39] : memref<32x128xf32, #tpu.memory_space<vmem>> -> memref<1x128xf32, #tpu.memory_space<vmem>>
    %135 = tpu.memref_slice %arg4[%c9_i32_36] : memref<16x!tpu.dma_semaphore, #tpu.memory_space<semaphore_mem>> -> memref<1x!tpu.dma_semaphore, #tpu.memory_space<semaphore_mem>>
    %136 = tpu.memref_squeeze %135 : memref<1x!tpu.dma_semaphore, #tpu.memory_space<semaphore_mem>> -> memref<!tpu.dma_semaphore, #tpu.memory_space<semaphore_mem>>
    tpu.enqueue_dma source(%133 : memref<1x128xf32, #tpu.memory_space<any>>) target(%134 : memref<1x128xf32, #tpu.memory_space<vmem>>) target_semaphore(%136 : memref<!tpu.dma_semaphore, #tpu.memory_space<semaphore_mem>>)
    %c10_i32_40 = arith.constant 10 : i32
    %c0_i32_41 = arith.constant 0 : i32
    %137 = tpu.memref_slice %arg2[%33, %c0_i32_41] : memref<128x128xf32, #tpu.memory_space<any>> -> memref<1x128xf32, #tpu.memory_space<any>>
    %c10_i32_42 = arith.constant 10 : i32
    %c0_i32_43 = arith.constant 0 : i32
    %138 = tpu.memref_slice %arg3[%c10_i32_42, %c0_i32_43] : memref<32x128xf32, #tpu.memory_space<vmem>> -> memref<1x128xf32, #tpu.memory_space<vmem>>
    %139 = tpu.memref_slice %arg4[%c10_i32_40] : memref<16x!tpu.dma_semaphore, #tpu.memory_space<semaphore_mem>> -> memref<1x!tpu.dma_semaphore, #tpu.memory_space<semaphore_mem>>
    %140 = tpu.memref_squeeze %139 : memref<1x!tpu.dma_semaphore, #tpu.memory_space<semaphore_mem>> -> memref<!tpu.dma_semaphore, #tpu.memory_space<semaphore_mem>>
    tpu.enqueue_dma source(%137 : memref<1x128xf32, #tpu.memory_space<any>>) target(%138 : memref<1x128xf32, #tpu.memory_space<vmem>>) target_semaphore(%140 : memref<!tpu.dma_semaphore, #tpu.memory_space<semaphore_mem>>)
    %c11_i32_44 = arith.constant 11 : i32
    %c0_i32_45 = arith.constant 0 : i32
    %141 = tpu.memref_slice %arg2[%36, %c0_i32_45] : memref<128x128xf32, #tpu.memory_space<any>> -> memref<1x128xf32, #tpu.memory_space<any>>
    %c11_i32_46 = arith.constant 11 : i32
    %c0_i32_47 = arith.constant 0 : i32
    %142 = tpu.memref_slice %arg3[%c11_i32_46, %c0_i32_47] : memref<32x128xf32, #tpu.memory_space<vmem>> -> memref<1x128xf32, #tpu.memory_space<vmem>>
    %143 = tpu.memref_slice %arg4[%c11_i32_44] : memref<16x!tpu.dma_semaphore, #tpu.memory_space<semaphore_mem>> -> memref<1x!tpu.dma_semaphore, #tpu.memory_space<semaphore_mem>>
    %144 = tpu.memref_squeeze %143 : memref<1x!tpu.dma_semaphore, #tpu.memory_space<semaphore_mem>> -> memref<!tpu.dma_semaphore, #tpu.memory_space<semaphore_mem>>
    tpu.enqueue_dma source(%141 : memref<1x128xf32, #tpu.memory_space<any>>) target(%142 : memref<1x128xf32, #tpu.memory_space<vmem>>) target_semaphore(%144 : memref<!tpu.dma_semaphore, #tpu.memory_space<semaphore_mem>>)
    %c12_i32_48 = arith.constant 12 : i32
    %c0_i32_49 = arith.constant 0 : i32
    %145 = tpu.memref_slice %arg2[%39, %c0_i32_49] : memref<128x128xf32, #tpu.memory_space<any>> -> memref<1x128xf32, #tpu.memory_space<any>>
    %c12_i32_50 = arith.constant 12 : i32
    %c0_i32_51 = arith.constant 0 : i32
    %146 = tpu.memref_slice %arg3[%c12_i32_50, %c0_i32_51] : memref<32x128xf32, #tpu.memory_space<vmem>> -> memref<1x128xf32, #tpu.memory_space<vmem>>
    %147 = tpu.memref_slice %arg4[%c12_i32_48] : memref<16x!tpu.dma_semaphore, #tpu.memory_space<semaphore_mem>> -> memref<1x!tpu.dma_semaphore, #tpu.memory_space<semaphore_mem>>
    %148 = tpu.memref_squeeze %147 : memref<1x!tpu.dma_semaphore, #tpu.memory_space<semaphore_mem>> -> memref<!tpu.dma_semaphore, #tpu.memory_space<semaphore_mem>>
    tpu.enqueue_dma source(%145 : memref<1x128xf32, #tpu.memory_space<any>>) target(%146 : memref<1x128xf32, #tpu.memory_space<vmem>>) target_semaphore(%148 : memref<!tpu.dma_semaphore, #tpu.memory_space<semaphore_mem>>)
    %c13_i32_52 = arith.constant 13 : i32
    %c0_i32_53 = arith.constant 0 : i32
    %149 = tpu.memref_slice %arg2[%42, %c0_i32_53] : memref<128x128xf32, #tpu.memory_space<any>> -> memref<1x128xf32, #tpu.memory_space<any>>
    %c13_i32_54 = arith.constant 13 : i32
    %c0_i32_55 = arith.constant 0 : i32
    %150 = tpu.memref_slice %arg3[%c13_i32_54, %c0_i32_55] : memref<32x128xf32, #tpu.memory_space<vmem>> -> memref<1x128xf32, #tpu.memory_space<vmem>>
    %151 = tpu.memref_slice %arg4[%c13_i32_52] : memref<16x!tpu.dma_semaphore, #tpu.memory_space<semaphore_mem>> -> memref<1x!tpu.dma_semaphore, #tpu.memory_space<semaphore_mem>>
    %152 = tpu.memref_squeeze %151 : memref<1x!tpu.dma_semaphore, #tpu.memory_space<semaphore_mem>> -> memref<!tpu.dma_semaphore, #tpu.memory_space<semaphore_mem>>
    tpu.enqueue_dma source(%149 : memref<1x128xf32, #tpu.memory_space<any>>) target(%150 : memref<1x128xf32, #tpu.memory_space<vmem>>) target_semaphore(%152 : memref<!tpu.dma_semaphore, #tpu.memory_space<semaphore_mem>>)
    %c14_i32_56 = arith.constant 14 : i32
    %c0_i32_57 = arith.constant 0 : i32
    %153 = tpu.memref_slice %arg2[%45, %c0_i32_57] : memref<128x128xf32, #tpu.memory_space<any>> -> memref<1x128xf32, #tpu.memory_space<any>>
    %c14_i32_58 = arith.constant 14 : i32
    %c0_i32_59 = arith.constant 0 : i32
    %154 = tpu.memref_slice %arg3[%c14_i32_58, %c0_i32_59] : memref<32x128xf32, #tpu.memory_space<vmem>> -> memref<1x128xf32, #tpu.memory_space<vmem>>
    %155 = tpu.memref_slice %arg4[%c14_i32_56] : memref<16x!tpu.dma_semaphore, #tpu.memory_space<semaphore_mem>> -> memref<1x!tpu.dma_semaphore, #tpu.memory_space<semaphore_mem>>
    %156 = tpu.memref_squeeze %155 : memref<1x!tpu.dma_semaphore, #tpu.memory_space<semaphore_mem>> -> memref<!tpu.dma_semaphore, #tpu.memory_space<semaphore_mem>>
    tpu.enqueue_dma source(%153 : memref<1x128xf32, #tpu.memory_space<any>>) target(%154 : memref<1x128xf32, #tpu.memory_space<vmem>>) target_semaphore(%156 : memref<!tpu.dma_semaphore, #tpu.memory_space<semaphore_mem>>)
    %c15_i32_60 = arith.constant 15 : i32
    %c0_i32_61 = arith.constant 0 : i32
    %157 = tpu.memref_slice %arg2[%48, %c0_i32_61] : memref<128x128xf32, #tpu.memory_space<any>> -> memref<1x128xf32, #tpu.memory_space<any>>
    %c15_i32_62 = arith.constant 15 : i32
    %c0_i32_63 = arith.constant 0 : i32
    %158 = tpu.memref_slice %arg3[%c15_i32_62, %c0_i32_63] : memref<32x128xf32, #tpu.memory_space<vmem>> -> memref<1x128xf32, #tpu.memory_space<vmem>>
    %159 = tpu.memref_slice %arg4[%c15_i32_60] : memref<16x!tpu.dma_semaphore, #tpu.memory_space<semaphore_mem>> -> memref<1x!tpu.dma_semaphore, #tpu.memory_space<semaphore_mem>>
    %160 = tpu.memref_squeeze %159 : memref<1x!tpu.dma_semaphore, #tpu.memory_space<semaphore_mem>> -> memref<!tpu.dma_semaphore, #tpu.memory_space<semaphore_mem>>
    tpu.enqueue_dma source(%157 : memref<1x128xf32, #tpu.memory_space<any>>) target(%158 : memref<1x128xf32, #tpu.memory_space<vmem>>) target_semaphore(%160 : memref<!tpu.dma_semaphore, #tpu.memory_space<semaphore_mem>>)
    %c0_i32_64 = arith.constant 0 : i32
    %c0_i32_65 = arith.constant 0 : i32
    %161 = tpu.memref_slice %arg2[%3, %c0_i32_65] : memref<128x128xf32, #tpu.memory_space<any>> -> memref<1x128xf32, #tpu.memory_space<any>>
    %c0_i32_66 = arith.constant 0 : i32
    %c0_i32_67 = arith.constant 0 : i32
    %162 = tpu.memref_slice %arg3[%c0_i32_66, %c0_i32_67] : memref<32x128xf32, #tpu.memory_space<vmem>> -> memref<1x128xf32, #tpu.memory_space<vmem>>
    %163 = tpu.memref_slice %arg4[%c0_i32_64] : memref<16x!tpu.dma_semaphore, #tpu.memory_space<semaphore_mem>> -> memref<1x!tpu.dma_semaphore, #tpu.memory_space<semaphore_mem>>
    %164 = tpu.memref_squeeze %163 : memref<1x!tpu.dma_semaphore, #tpu.memory_space<semaphore_mem>> -> memref<!tpu.dma_semaphore, #tpu.memory_space<semaphore_mem>>
    tpu.wait_dma2 semaphore(%164 : memref<!tpu.dma_semaphore, #tpu.memory_space<semaphore_mem>>) src(%161 : memref<1x128xf32, #tpu.memory_space<any>>) dst(%162 : memref<1x128xf32, #tpu.memory_space<vmem>>)
    %c0_i32_68 = arith.constant 0 : i32
    %c0_i32_69 = arith.constant 0 : i32
    %165 = tpu.memref_slice %arg2[%51, %c0_i32_69] : memref<128x128xf32, #tpu.memory_space<any>> -> memref<1x128xf32, #tpu.memory_space<any>>
    %c16_i32_70 = arith.constant 16 : i32
    %c0_i32_71 = arith.constant 0 : i32
    %166 = tpu.memref_slice %arg3[%c16_i32_70, %c0_i32_71] : memref<32x128xf32, #tpu.memory_space<vmem>> -> memref<1x128xf32, #tpu.memory_space<vmem>>
    %167 = tpu.memref_slice %arg4[%c0_i32_68] : memref<16x!tpu.dma_semaphore, #tpu.memory_space<semaphore_mem>> -> memref<1x!tpu.dma_semaphore, #tpu.memory_space<semaphore_mem>>
    %168 = tpu.memref_squeeze %167 : memref<1x!tpu.dma_semaphore, #tpu.memory_space<semaphore_mem>> -> memref<!tpu.dma_semaphore, #tpu.memory_space<semaphore_mem>>
    tpu.enqueue_dma source(%165 : memref<1x128xf32, #tpu.memory_space<any>>) target(%166 : memref<1x128xf32, #tpu.memory_space<vmem>>) target_semaphore(%168 : memref<!tpu.dma_semaphore, #tpu.memory_space<semaphore_mem>>)
    %c1_i32_72 = arith.constant 1 : i32
    %c0_i32_73 = arith.constant 0 : i32
    %169 = tpu.memref_slice %arg2[%6, %c0_i32_73] : memref<128x128xf32, #tpu.memory_space<any>> -> memref<1x128xf32, #tpu.memory_space<any>>
    %c1_i32_74 = arith.constant 1 : i32
    %c0_i32_75 = arith.constant 0 : i32
    %170 = tpu.memref_slice %arg3[%c1_i32_74, %c0_i32_75] : memref<32x128xf32, #tpu.memory_space<vmem>> -> memref<1x128xf32, #tpu.memory_space<vmem>>
    %171 = tpu.memref_slice %arg4[%c1_i32_72] : memref<16x!tpu.dma_semaphore, #tpu.memory_space<semaphore_mem>> -> memref<1x!tpu.dma_semaphore, #tpu.memory_space<semaphore_mem>>
    %172 = tpu.memref_squeeze %171 : memref<1x!tpu.dma_semaphore, #tpu.memory_space<semaphore_mem>> -> memref<!tpu.dma_semaphore, #tpu.memory_space<semaphore_mem>>
    tpu.wait_dma2 semaphore(%172 : memref<!tpu.dma_semaphore, #tpu.memory_space<semaphore_mem>>) src(%169 : memref<1x128xf32, #tpu.memory_space<any>>) dst(%170 : memref<1x128xf32, #tpu.memory_space<vmem>>)
    %c1_i32_76 = arith.constant 1 : i32
    %c0_i32_77 = arith.constant 0 : i32
    %173 = tpu.memref_slice %arg2[%54, %c0_i32_77] : memref<128x128xf32, #tpu.memory_space<any>> -> memref<1x128xf32, #tpu.memory_space<any>>
    %c17_i32_78 = arith.constant 17 : i32
    %c0_i32_79 = arith.constant 0 : i32
    %174 = tpu.memref_slice %arg3[%c17_i32_78, %c0_i32_79] : memref<32x128xf32, #tpu.memory_space<vmem>> -> memref<1x128xf32, #tpu.memory_space<vmem>>
    %175 = tpu.memref_slice %arg4[%c1_i32_76] : memref<16x!tpu.dma_semaphore, #tpu.memory_space<semaphore_mem>> -> memref<1x!tpu.dma_semaphore, #tpu.memory_space<semaphore_mem>>
    %176 = tpu.memref_squeeze %175 : memref<1x!tpu.dma_semaphore, #tpu.memory_space<semaphore_mem>> -> memref<!tpu.dma_semaphore, #tpu.memory_space<semaphore_mem>>
    tpu.enqueue_dma source(%173 : memref<1x128xf32, #tpu.memory_space<any>>) target(%174 : memref<1x128xf32, #tpu.memory_space<vmem>>) target_semaphore(%176 : memref<!tpu.dma_semaphore, #tpu.memory_space<semaphore_mem>>)
    %c2_i32_80 = arith.constant 2 : i32
    %c0_i32_81 = arith.constant 0 : i32
    %177 = tpu.memref_slice %arg2[%9, %c0_i32_81] : memref<128x128xf32, #tpu.memory_space<any>> -> memref<1x128xf32, #tpu.memory_space<any>>
    %c2_i32_82 = arith.constant 2 : i32
    %c0_i32_83 = arith.constant 0 : i32
    %178 = tpu.memref_slice %arg3[%c2_i32_82, %c0_i32_83] : memref<32x128xf32, #tpu.memory_space<vmem>> -> memref<1x128xf32, #tpu.memory_space<vmem>>
    %179 = tpu.memref_slice %arg4[%c2_i32_80] : memref<16x!tpu.dma_semaphore, #tpu.memory_space<semaphore_mem>> -> memref<1x!tpu.dma_semaphore, #tpu.memory_space<semaphore_mem>>
    %180 = tpu.memref_squeeze %179 : memref<1x!tpu.dma_semaphore, #tpu.memory_space<semaphore_mem>> -> memref<!tpu.dma_semaphore, #tpu.memory_space<semaphore_mem>>
    tpu.wait_dma2 semaphore(%180 : memref<!tpu.dma_semaphore, #tpu.memory_space<semaphore_mem>>) src(%177 : memref<1x128xf32, #tpu.memory_space<any>>) dst(%178 : memref<1x128xf32, #tpu.memory_space<vmem>>)
    %c2_i32_84 = arith.constant 2 : i32
    %c0_i32_85 = arith.constant 0 : i32
    %181 = tpu.memref_slice %arg2[%57, %c0_i32_85] : memref<128x128xf32, #tpu.memory_space<any>> -> memref<1x128xf32, #tpu.memory_space<any>>
    %c18_i32_86 = arith.constant 18 : i32
    %c0_i32_87 = arith.constant 0 : i32
    %182 = tpu.memref_slice %arg3[%c18_i32_86, %c0_i32_87] : memref<32x128xf32, #tpu.memory_space<vmem>> -> memref<1x128xf32, #tpu.memory_space<vmem>>
    %183 = tpu.memref_slice %arg4[%c2_i32_84] : memref<16x!tpu.dma_semaphore, #tpu.memory_space<semaphore_mem>> -> memref<1x!tpu.dma_semaphore, #tpu.memory_space<semaphore_mem>>
    %184 = tpu.memref_squeeze %183 : memref<1x!tpu.dma_semaphore, #tpu.memory_space<semaphore_mem>> -> memref<!tpu.dma_semaphore, #tpu.memory_space<semaphore_mem>>
    tpu.enqueue_dma source(%181 : memref<1x128xf32, #tpu.memory_space<any>>) target(%182 : memref<1x128xf32, #tpu.memory_space<vmem>>) target_semaphore(%184 : memref<!tpu.dma_semaphore, #tpu.memory_space<semaphore_mem>>)
    %c3_i32_88 = arith.constant 3 : i32
    %c0_i32_89 = arith.constant 0 : i32
    %185 = tpu.memref_slice %arg2[%12, %c0_i32_89] : memref<128x128xf32, #tpu.memory_space<any>> -> memref<1x128xf32, #tpu.memory_space<any>>
    %c3_i32_90 = arith.constant 3 : i32
    %c0_i32_91 = arith.constant 0 : i32
    %186 = tpu.memref_slice %arg3[%c3_i32_90, %c0_i32_91] : memref<32x128xf32, #tpu.memory_space<vmem>> -> memref<1x128xf32, #tpu.memory_space<vmem>>
    %187 = tpu.memref_slice %arg4[%c3_i32_88] : memref<16x!tpu.dma_semaphore, #tpu.memory_space<semaphore_mem>> -> memref<1x!tpu.dma_semaphore, #tpu.memory_space<semaphore_mem>>
    %188 = tpu.memref_squeeze %187 : memref<1x!tpu.dma_semaphore, #tpu.memory_space<semaphore_mem>> -> memref<!tpu.dma_semaphore, #tpu.memory_space<semaphore_mem>>
    tpu.wait_dma2 semaphore(%188 : memref<!tpu.dma_semaphore, #tpu.memory_space<semaphore_mem>>) src(%185 : memref<1x128xf32, #tpu.memory_space<any>>) dst(%186 : memref<1x128xf32, #tpu.memory_space<vmem>>)
    %c3_i32_92 = arith.constant 3 : i32
    %c0_i32_93 = arith.constant 0 : i32
    %189 = tpu.memref_slice %arg2[%60, %c0_i32_93] : memref<128x128xf32, #tpu.memory_space<any>> -> memref<1x128xf32, #tpu.memory_space<any>>
    %c19_i32_94 = arith.constant 19 : i32
    %c0_i32_95 = arith.constant 0 : i32
    %190 = tpu.memref_slice %arg3[%c19_i32_94, %c0_i32_95] : memref<32x128xf32, #tpu.memory_space<vmem>> -> memref<1x128xf32, #tpu.memory_space<vmem>>
    %191 = tpu.memref_slice %arg4[%c3_i32_92] : memref<16x!tpu.dma_semaphore, #tpu.memory_space<semaphore_mem>> -> memref<1x!tpu.dma_semaphore, #tpu.memory_space<semaphore_mem>>
    %192 = tpu.memref_squeeze %191 : memref<1x!tpu.dma_semaphore, #tpu.memory_space<semaphore_mem>> -> memref<!tpu.dma_semaphore, #tpu.memory_space<semaphore_mem>>
    tpu.enqueue_dma source(%189 : memref<1x128xf32, #tpu.memory_space<any>>) target(%190 : memref<1x128xf32, #tpu.memory_space<vmem>>) target_semaphore(%192 : memref<!tpu.dma_semaphore, #tpu.memory_space<semaphore_mem>>)
    %c4_i32_96 = arith.constant 4 : i32
    %c0_i32_97 = arith.constant 0 : i32
    %193 = tpu.memref_slice %arg2[%15, %c0_i32_97] : memref<128x128xf32, #tpu.memory_space<any>> -> memref<1x128xf32, #tpu.memory_space<any>>
    %c4_i32_98 = arith.constant 4 : i32
    %c0_i32_99 = arith.constant 0 : i32
    %194 = tpu.memref_slice %arg3[%c4_i32_98, %c0_i32_99] : memref<32x128xf32, #tpu.memory_space<vmem>> -> memref<1x128xf32, #tpu.memory_space<vmem>>
    %195 = tpu.memref_slice %arg4[%c4_i32_96] : memref<16x!tpu.dma_semaphore, #tpu.memory_space<semaphore_mem>> -> memref<1x!tpu.dma_semaphore, #tpu.memory_space<semaphore_mem>>
    %196 = tpu.memref_squeeze %195 : memref<1x!tpu.dma_semaphore, #tpu.memory_space<semaphore_mem>> -> memref<!tpu.dma_semaphore, #tpu.memory_space<semaphore_mem>>
    tpu.wait_dma2 semaphore(%196 : memref<!tpu.dma_semaphore, #tpu.memory_space<semaphore_mem>>) src(%193 : memref<1x128xf32, #tpu.memory_space<any>>) dst(%194 : memref<1x128xf32, #tpu.memory_space<vmem>>)
    %c4_i32_100 = arith.constant 4 : i32
    %c0_i32_101 = arith.constant 0 : i32
    %197 = tpu.memref_slice %arg2[%63, %c0_i32_101] : memref<128x128xf32, #tpu.memory_space<any>> -> memref<1x128xf32, #tpu.memory_space<any>>
    %c20_i32_102 = arith.constant 20 : i32
    %c0_i32_103 = arith.constant 0 : i32
    %198 = tpu.memref_slice %arg3[%c20_i32_102, %c0_i32_103] : memref<32x128xf32, #tpu.memory_space<vmem>> -> memref<1x128xf32, #tpu.memory_space<vmem>>
    %199 = tpu.memref_slice %arg4[%c4_i32_100] : memref<16x!tpu.dma_semaphore, #tpu.memory_space<semaphore_mem>> -> memref<1x!tpu.dma_semaphore, #tpu.memory_space<semaphore_mem>>
    %200 = tpu.memref_squeeze %199 : memref<1x!tpu.dma_semaphore, #tpu.memory_space<semaphore_mem>> -> memref<!tpu.dma_semaphore, #tpu.memory_space<semaphore_mem>>
    tpu.enqueue_dma source(%197 : memref<1x128xf32, #tpu.memory_space<any>>) target(%198 : memref<1x128xf32, #tpu.memory_space<vmem>>) target_semaphore(%200 : memref<!tpu.dma_semaphore, #tpu.memory_space<semaphore_mem>>)
    %c5_i32_104 = arith.constant 5 : i32
    %c0_i32_105 = arith.constant 0 : i32
    %201 = tpu.memref_slice %arg2[%18, %c0_i32_105] : memref<128x128xf32, #tpu.memory_space<any>> -> memref<1x128xf32, #tpu.memory_space<any>>
    %c5_i32_106 = arith.constant 5 : i32
    %c0_i32_107 = arith.constant 0 : i32
    %202 = tpu.memref_slice %arg3[%c5_i32_106, %c0_i32_107] : memref<32x128xf32, #tpu.memory_space<vmem>> -> memref<1x128xf32, #tpu.memory_space<vmem>>
    %203 = tpu.memref_slice %arg4[%c5_i32_104] : memref<16x!tpu.dma_semaphore, #tpu.memory_space<semaphore_mem>> -> memref<1x!tpu.dma_semaphore, #tpu.memory_space<semaphore_mem>>
    %204 = tpu.memref_squeeze %203 : memref<1x!tpu.dma_semaphore, #tpu.memory_space<semaphore_mem>> -> memref<!tpu.dma_semaphore, #tpu.memory_space<semaphore_mem>>
    tpu.wait_dma2 semaphore(%204 : memref<!tpu.dma_semaphore, #tpu.memory_space<semaphore_mem>>) src(%201 : memref<1x128xf32, #tpu.memory_space<any>>) dst(%202 : memref<1x128xf32, #tpu.memory_space<vmem>>)
    %c5_i32_108 = arith.constant 5 : i32
    %c0_i32_109 = arith.constant 0 : i32
    %205 = tpu.memref_slice %arg2[%66, %c0_i32_109] : memref<128x128xf32, #tpu.memory_space<any>> -> memref<1x128xf32, #tpu.memory_space<any>>
    %c21_i32_110 = arith.constant 21 : i32
    %c0_i32_111 = arith.constant 0 : i32
    %206 = tpu.memref_slice %arg3[%c21_i32_110, %c0_i32_111] : memref<32x128xf32, #tpu.memory_space<vmem>> -> memref<1x128xf32, #tpu.memory_space<vmem>>
    %207 = tpu.memref_slice %arg4[%c5_i32_108] : memref<16x!tpu.dma_semaphore, #tpu.memory_space<semaphore_mem>> -> memref<1x!tpu.dma_semaphore, #tpu.memory_space<semaphore_mem>>
    %208 = tpu.memref_squeeze %207 : memref<1x!tpu.dma_semaphore, #tpu.memory_space<semaphore_mem>> -> memref<!tpu.dma_semaphore, #tpu.memory_space<semaphore_mem>>
    tpu.enqueue_dma source(%205 : memref<1x128xf32, #tpu.memory_space<any>>) target(%206 : memref<1x128xf32, #tpu.memory_space<vmem>>) target_semaphore(%208 : memref<!tpu.dma_semaphore, #tpu.memory_space<semaphore_mem>>)
    %c6_i32_112 = arith.constant 6 : i32
    %c0_i32_113 = arith.constant 0 : i32
    %209 = tpu.memref_slice %arg2[%21, %c0_i32_113] : memref<128x128xf32, #tpu.memory_space<any>> -> memref<1x128xf32, #tpu.memory_space<any>>
    %c6_i32_114 = arith.constant 6 : i32
    %c0_i32_115 = arith.constant 0 : i32
    %210 = tpu.memref_slice %arg3[%c6_i32_114, %c0_i32_115] : memref<32x128xf32, #tpu.memory_space<vmem>> -> memref<1x128xf32, #tpu.memory_space<vmem>>
    %211 = tpu.memref_slice %arg4[%c6_i32_112] : memref<16x!tpu.dma_semaphore, #tpu.memory_space<semaphore_mem>> -> memref<1x!tpu.dma_semaphore, #tpu.memory_space<semaphore_mem>>
    %212 = tpu.memref_squeeze %211 : memref<1x!tpu.dma_semaphore, #tpu.memory_space<semaphore_mem>> -> memref<!tpu.dma_semaphore, #tpu.memory_space<semaphore_mem>>
    tpu.wait_dma2 semaphore(%212 : memref<!tpu.dma_semaphore, #tpu.memory_space<semaphore_mem>>) src(%209 : memref<1x128xf32, #tpu.memory_space<any>>) dst(%210 : memref<1x128xf32, #tpu.memory_space<vmem>>)
    %c6_i32_116 = arith.constant 6 : i32
    %c0_i32_117 = arith.constant 0 : i32
    %213 = tpu.memref_slice %arg2[%69, %c0_i32_117] : memref<128x128xf32, #tpu.memory_space<any>> -> memref<1x128xf32, #tpu.memory_space<any>>
    %c22_i32_118 = arith.constant 22 : i32
    %c0_i32_119 = arith.constant 0 : i32
    %214 = tpu.memref_slice %arg3[%c22_i32_118, %c0_i32_119] : memref<32x128xf32, #tpu.memory_space<vmem>> -> memref<1x128xf32, #tpu.memory_space<vmem>>
    %215 = tpu.memref_slice %arg4[%c6_i32_116] : memref<16x!tpu.dma_semaphore, #tpu.memory_space<semaphore_mem>> -> memref<1x!tpu.dma_semaphore, #tpu.memory_space<semaphore_mem>>
    %216 = tpu.memref_squeeze %215 : memref<1x!tpu.dma_semaphore, #tpu.memory_space<semaphore_mem>> -> memref<!tpu.dma_semaphore, #tpu.memory_space<semaphore_mem>>
    tpu.enqueue_dma source(%213 : memref<1x128xf32, #tpu.memory_space<any>>) target(%214 : memref<1x128xf32, #tpu.memory_space<vmem>>) target_semaphore(%216 : memref<!tpu.dma_semaphore, #tpu.memory_space<semaphore_mem>>)
    %c7_i32_120 = arith.constant 7 : i32
    %c0_i32_121 = arith.constant 0 : i32
    %217 = tpu.memref_slice %arg2[%24, %c0_i32_121] : memref<128x128xf32, #tpu.memory_space<any>> -> memref<1x128xf32, #tpu.memory_space<any>>
    %c7_i32_122 = arith.constant 7 : i32
    %c0_i32_123 = arith.constant 0 : i32
    %218 = tpu.memref_slice %arg3[%c7_i32_122, %c0_i32_123] : memref<32x128xf32, #tpu.memory_space<vmem>> -> memref<1x128xf32, #tpu.memory_space<vmem>>
    %219 = tpu.memref_slice %arg4[%c7_i32_120] : memref<16x!tpu.dma_semaphore, #tpu.memory_space<semaphore_mem>> -> memref<1x!tpu.dma_semaphore, #tpu.memory_space<semaphore_mem>>
    %220 = tpu.memref_squeeze %219 : memref<1x!tpu.dma_semaphore, #tpu.memory_space<semaphore_mem>> -> memref<!tpu.dma_semaphore, #tpu.memory_space<semaphore_mem>>
    tpu.wait_dma2 semaphore(%220 : memref<!tpu.dma_semaphore, #tpu.memory_space<semaphore_mem>>) src(%217 : memref<1x128xf32, #tpu.memory_space<any>>) dst(%218 : memref<1x128xf32, #tpu.memory_space<vmem>>)
    %c7_i32_124 = arith.constant 7 : i32
    %c0_i32_125 = arith.constant 0 : i32
    %221 = tpu.memref_slice %arg2[%72, %c0_i32_125] : memref<128x128xf32, #tpu.memory_space<any>> -> memref<1x128xf32, #tpu.memory_space<any>>
    %c23_i32_126 = arith.constant 23 : i32
    %c0_i32_127 = arith.constant 0 : i32
    %222 = tpu.memref_slice %arg3[%c23_i32_126, %c0_i32_127] : memref<32x128xf32, #tpu.memory_space<vmem>> -> memref<1x128xf32, #tpu.memory_space<vmem>>
    %223 = tpu.memref_slice %arg4[%c7_i32_124] : memref<16x!tpu.dma_semaphore, #tpu.memory_space<semaphore_mem>> -> memref<1x!tpu.dma_semaphore, #tpu.memory_space<semaphore_mem>>
    %224 = tpu.memref_squeeze %223 : memref<1x!tpu.dma_semaphore, #tpu.memory_space<semaphore_mem>> -> memref<!tpu.dma_semaphore, #tpu.memory_space<semaphore_mem>>
    tpu.enqueue_dma source(%221 : memref<1x128xf32, #tpu.memory_space<any>>) target(%222 : memref<1x128xf32, #tpu.memory_space<vmem>>) target_semaphore(%224 : memref<!tpu.dma_semaphore, #tpu.memory_space<semaphore_mem>>)
    %c8_i32_128 = arith.constant 8 : i32
    %c0_i32_129 = arith.constant 0 : i32
    %225 = tpu.memref_slice %arg2[%27, %c0_i32_129] : memref<128x128xf32, #tpu.memory_space<any>> -> memref<1x128xf32, #tpu.memory_space<any>>
    %c8_i32_130 = arith.constant 8 : i32
    %c0_i32_131 = arith.constant 0 : i32
    %226 = tpu.memref_slice %arg3[%c8_i32_130, %c0_i32_131] : memref<32x128xf32, #tpu.memory_space<vmem>> -> memref<1x128xf32, #tpu.memory_space<vmem>>
    %227 = tpu.memref_slice %arg4[%c8_i32_128] : memref<16x!tpu.dma_semaphore, #tpu.memory_space<semaphore_mem>> -> memref<1x!tpu.dma_semaphore, #tpu.memory_space<semaphore_mem>>
    %228 = tpu.memref_squeeze %227 : memref<1x!tpu.dma_semaphore, #tpu.memory_space<semaphore_mem>> -> memref<!tpu.dma_semaphore, #tpu.memory_space<semaphore_mem>>
    tpu.wait_dma2 semaphore(%228 : memref<!tpu.dma_semaphore, #tpu.memory_space<semaphore_mem>>) src(%225 : memref<1x128xf32, #tpu.memory_space<any>>) dst(%226 : memref<1x128xf32, #tpu.memory_space<vmem>>)
    %c8_i32_132 = arith.constant 8 : i32
    %c0_i32_133 = arith.constant 0 : i32
    %229 = tpu.memref_slice %arg2[%75, %c0_i32_133] : memref<128x128xf32, #tpu.memory_space<any>> -> memref<1x128xf32, #tpu.memory_space<any>>
    %c24_i32_134 = arith.constant 24 : i32
    %c0_i32_135 = arith.constant 0 : i32
    %230 = tpu.memref_slice %arg3[%c24_i32_134, %c0_i32_135] : memref<32x128xf32, #tpu.memory_space<vmem>> -> memref<1x128xf32, #tpu.memory_space<vmem>>
    %231 = tpu.memref_slice %arg4[%c8_i32_132] : memref<16x!tpu.dma_semaphore, #tpu.memory_space<semaphore_mem>> -> memref<1x!tpu.dma_semaphore, #tpu.memory_space<semaphore_mem>>
    %232 = tpu.memref_squeeze %231 : memref<1x!tpu.dma_semaphore, #tpu.memory_space<semaphore_mem>> -> memref<!tpu.dma_semaphore, #tpu.memory_space<semaphore_mem>>
    tpu.enqueue_dma source(%229 : memref<1x128xf32, #tpu.memory_space<any>>) target(%230 : memref<1x128xf32, #tpu.memory_space<vmem>>) target_semaphore(%232 : memref<!tpu.dma_semaphore, #tpu.memory_space<semaphore_mem>>)
    %c9_i32_136 = arith.constant 9 : i32
    %c0_i32_137 = arith.constant 0 : i32
    %233 = tpu.memref_slice %arg2[%30, %c0_i32_137] : memref<128x128xf32, #tpu.memory_space<any>> -> memref<1x128xf32, #tpu.memory_space<any>>
    %c9_i32_138 = arith.constant 9 : i32
    %c0_i32_139 = arith.constant 0 : i32
    %234 = tpu.memref_slice %arg3[%c9_i32_138, %c0_i32_139] : memref<32x128xf32, #tpu.memory_space<vmem>> -> memref<1x128xf32, #tpu.memory_space<vmem>>
    %235 = tpu.memref_slice %arg4[%c9_i32_136] : memref<16x!tpu.dma_semaphore, #tpu.memory_space<semaphore_mem>> -> memref<1x!tpu.dma_semaphore, #tpu.memory_space<semaphore_mem>>
    %236 = tpu.memref_squeeze %235 : memref<1x!tpu.dma_semaphore, #tpu.memory_space<semaphore_mem>> -> memref<!tpu.dma_semaphore, #tpu.memory_space<semaphore_mem>>
    tpu.wait_dma2 semaphore(%236 : memref<!tpu.dma_semaphore, #tpu.memory_space<semaphore_mem>>) src(%233 : memref<1x128xf32, #tpu.memory_space<any>>) dst(%234 : memref<1x128xf32, #tpu.memory_space<vmem>>)
    %c9_i32_140 = arith.constant 9 : i32
    %c0_i32_141 = arith.constant 0 : i32
    %237 = tpu.memref_slice %arg2[%78, %c0_i32_141] : memref<128x128xf32, #tpu.memory_space<any>> -> memref<1x128xf32, #tpu.memory_space<any>>
    %c25_i32_142 = arith.constant 25 : i32
    %c0_i32_143 = arith.constant 0 : i32
    %238 = tpu.memref_slice %arg3[%c25_i32_142, %c0_i32_143] : memref<32x128xf32, #tpu.memory_space<vmem>> -> memref<1x128xf32, #tpu.memory_space<vmem>>
    %239 = tpu.memref_slice %arg4[%c9_i32_140] : memref<16x!tpu.dma_semaphore, #tpu.memory_space<semaphore_mem>> -> memref<1x!tpu.dma_semaphore, #tpu.memory_space<semaphore_mem>>
    %240 = tpu.memref_squeeze %239 : memref<1x!tpu.dma_semaphore, #tpu.memory_space<semaphore_mem>> -> memref<!tpu.dma_semaphore, #tpu.memory_space<semaphore_mem>>
    tpu.enqueue_dma source(%237 : memref<1x128xf32, #tpu.memory_space<any>>) target(%238 : memref<1x128xf32, #tpu.memory_space<vmem>>) target_semaphore(%240 : memref<!tpu.dma_semaphore, #tpu.memory_space<semaphore_mem>>)
    %c10_i32_144 = arith.constant 10 : i32
    %c0_i32_145 = arith.constant 0 : i32
    %241 = tpu.memref_slice %arg2[%33, %c0_i32_145] : memref<128x128xf32, #tpu.memory_space<any>> -> memref<1x128xf32, #tpu.memory_space<any>>
    %c10_i32_146 = arith.constant 10 : i32
    %c0_i32_147 = arith.constant 0 : i32
    %242 = tpu.memref_slice %arg3[%c10_i32_146, %c0_i32_147] : memref<32x128xf32, #tpu.memory_space<vmem>> -> memref<1x128xf32, #tpu.memory_space<vmem>>
    %243 = tpu.memref_slice %arg4[%c10_i32_144] : memref<16x!tpu.dma_semaphore, #tpu.memory_space<semaphore_mem>> -> memref<1x!tpu.dma_semaphore, #tpu.memory_space<semaphore_mem>>
    %244 = tpu.memref_squeeze %243 : memref<1x!tpu.dma_semaphore, #tpu.memory_space<semaphore_mem>> -> memref<!tpu.dma_semaphore, #tpu.memory_space<semaphore_mem>>
    tpu.wait_dma2 semaphore(%244 : memref<!tpu.dma_semaphore, #tpu.memory_space<semaphore_mem>>) src(%241 : memref<1x128xf32, #tpu.memory_space<any>>) dst(%242 : memref<1x128xf32, #tpu.memory_space<vmem>>)
    %c10_i32_148 = arith.constant 10 : i32
    %c0_i32_149 = arith.constant 0 : i32
    %245 = tpu.memref_slice %arg2[%81, %c0_i32_149] : memref<128x128xf32, #tpu.memory_space<any>> -> memref<1x128xf32, #tpu.memory_space<any>>
    %c26_i32_150 = arith.constant 26 : i32
    %c0_i32_151 = arith.constant 0 : i32
    %246 = tpu.memref_slice %arg3[%c26_i32_150, %c0_i32_151] : memref<32x128xf32, #tpu.memory_space<vmem>> -> memref<1x128xf32, #tpu.memory_space<vmem>>
    %247 = tpu.memref_slice %arg4[%c10_i32_148] : memref<16x!tpu.dma_semaphore, #tpu.memory_space<semaphore_mem>> -> memref<1x!tpu.dma_semaphore, #tpu.memory_space<semaphore_mem>>
    %248 = tpu.memref_squeeze %247 : memref<1x!tpu.dma_semaphore, #tpu.memory_space<semaphore_mem>> -> memref<!tpu.dma_semaphore, #tpu.memory_space<semaphore_mem>>
    tpu.enqueue_dma source(%245 : memref<1x128xf32, #tpu.memory_space<any>>) target(%246 : memref<1x128xf32, #tpu.memory_space<vmem>>) target_semaphore(%248 : memref<!tpu.dma_semaphore, #tpu.memory_space<semaphore_mem>>)
    %c11_i32_152 = arith.constant 11 : i32
    %c0_i32_153 = arith.constant 0 : i32
    %249 = tpu.memref_slice %arg2[%36, %c0_i32_153] : memref<128x128xf32, #tpu.memory_space<any>> -> memref<1x128xf32, #tpu.memory_space<any>>
    %c11_i32_154 = arith.constant 11 : i32
    %c0_i32_155 = arith.constant 0 : i32
    %250 = tpu.memref_slice %arg3[%c11_i32_154, %c0_i32_155] : memref<32x128xf32, #tpu.memory_space<vmem>> -> memref<1x128xf32, #tpu.memory_space<vmem>>
    %251 = tpu.memref_slice %arg4[%c11_i32_152] : memref<16x!tpu.dma_semaphore, #tpu.memory_space<semaphore_mem>> -> memref<1x!tpu.dma_semaphore, #tpu.memory_space<semaphore_mem>>
    %252 = tpu.memref_squeeze %251 : memref<1x!tpu.dma_semaphore, #tpu.memory_space<semaphore_mem>> -> memref<!tpu.dma_semaphore, #tpu.memory_space<semaphore_mem>>
    tpu.wait_dma2 semaphore(%252 : memref<!tpu.dma_semaphore, #tpu.memory_space<semaphore_mem>>) src(%249 : memref<1x128xf32, #tpu.memory_space<any>>) dst(%250 : memref<1x128xf32, #tpu.memory_space<vmem>>)
    %c11_i32_156 = arith.constant 11 : i32
    %c0_i32_157 = arith.constant 0 : i32
    %253 = tpu.memref_slice %arg2[%84, %c0_i32_157] : memref<128x128xf32, #tpu.memory_space<any>> -> memref<1x128xf32, #tpu.memory_space<any>>
    %c27_i32_158 = arith.constant 27 : i32
    %c0_i32_159 = arith.constant 0 : i32
    %254 = tpu.memref_slice %arg3[%c27_i32_158, %c0_i32_159] : memref<32x128xf32, #tpu.memory_space<vmem>> -> memref<1x128xf32, #tpu.memory_space<vmem>>
    %255 = tpu.memref_slice %arg4[%c11_i32_156] : memref<16x!tpu.dma_semaphore, #tpu.memory_space<semaphore_mem>> -> memref<1x!tpu.dma_semaphore, #tpu.memory_space<semaphore_mem>>
    %256 = tpu.memref_squeeze %255 : memref<1x!tpu.dma_semaphore, #tpu.memory_space<semaphore_mem>> -> memref<!tpu.dma_semaphore, #tpu.memory_space<semaphore_mem>>
    tpu.enqueue_dma source(%253 : memref<1x128xf32, #tpu.memory_space<any>>) target(%254 : memref<1x128xf32, #tpu.memory_space<vmem>>) target_semaphore(%256 : memref<!tpu.dma_semaphore, #tpu.memory_space<semaphore_mem>>)
    %c12_i32_160 = arith.constant 12 : i32
    %c0_i32_161 = arith.constant 0 : i32
    %257 = tpu.memref_slice %arg2[%39, %c0_i32_161] : memref<128x128xf32, #tpu.memory_space<any>> -> memref<1x128xf32, #tpu.memory_space<any>>
    %c12_i32_162 = arith.constant 12 : i32
    %c0_i32_163 = arith.constant 0 : i32
    %258 = tpu.memref_slice %arg3[%c12_i32_162, %c0_i32_163] : memref<32x128xf32, #tpu.memory_space<vmem>> -> memref<1x128xf32, #tpu.memory_space<vmem>>
    %259 = tpu.memref_slice %arg4[%c12_i32_160] : memref<16x!tpu.dma_semaphore, #tpu.memory_space<semaphore_mem>> -> memref<1x!tpu.dma_semaphore, #tpu.memory_space<semaphore_mem>>
    %260 = tpu.memref_squeeze %259 : memref<1x!tpu.dma_semaphore, #tpu.memory_space<semaphore_mem>> -> memref<!tpu.dma_semaphore, #tpu.memory_space<semaphore_mem>>
    tpu.wait_dma2 semaphore(%260 : memref<!tpu.dma_semaphore, #tpu.memory_space<semaphore_mem>>) src(%257 : memref<1x128xf32, #tpu.memory_space<any>>) dst(%258 : memref<1x128xf32, #tpu.memory_space<vmem>>)
    %c12_i32_164 = arith.constant 12 : i32
    %c0_i32_165 = arith.constant 0 : i32
    %261 = tpu.memref_slice %arg2[%87, %c0_i32_165] : memref<128x128xf32, #tpu.memory_space<any>> -> memref<1x128xf32, #tpu.memory_space<any>>
    %c28_i32_166 = arith.constant 28 : i32
    %c0_i32_167 = arith.constant 0 : i32
    %262 = tpu.memref_slice %arg3[%c28_i32_166, %c0_i32_167] : memref<32x128xf32, #tpu.memory_space<vmem>> -> memref<1x128xf32, #tpu.memory_space<vmem>>
    %263 = tpu.memref_slice %arg4[%c12_i32_164] : memref<16x!tpu.dma_semaphore, #tpu.memory_space<semaphore_mem>> -> memref<1x!tpu.dma_semaphore, #tpu.memory_space<semaphore_mem>>
    %264 = tpu.memref_squeeze %263 : memref<1x!tpu.dma_semaphore, #tpu.memory_space<semaphore_mem>> -> memref<!tpu.dma_semaphore, #tpu.memory_space<semaphore_mem>>
    tpu.enqueue_dma source(%261 : memref<1x128xf32, #tpu.memory_space<any>>) target(%262 : memref<1x128xf32, #tpu.memory_space<vmem>>) target_semaphore(%264 : memref<!tpu.dma_semaphore, #tpu.memory_space<semaphore_mem>>)
    %c13_i32_168 = arith.constant 13 : i32
    %c0_i32_169 = arith.constant 0 : i32
    %265 = tpu.memref_slice %arg2[%42, %c0_i32_169] : memref<128x128xf32, #tpu.memory_space<any>> -> memref<1x128xf32, #tpu.memory_space<any>>
    %c13_i32_170 = arith.constant 13 : i32
    %c0_i32_171 = arith.constant 0 : i32
    %266 = tpu.memref_slice %arg3[%c13_i32_170, %c0_i32_171] : memref<32x128xf32, #tpu.memory_space<vmem>> -> memref<1x128xf32, #tpu.memory_space<vmem>>
    %267 = tpu.memref_slice %arg4[%c13_i32_168] : memref<16x!tpu.dma_semaphore, #tpu.memory_space<semaphore_mem>> -> memref<1x!tpu.dma_semaphore, #tpu.memory_space<semaphore_mem>>
    %268 = tpu.memref_squeeze %267 : memref<1x!tpu.dma_semaphore, #tpu.memory_space<semaphore_mem>> -> memref<!tpu.dma_semaphore, #tpu.memory_space<semaphore_mem>>
    tpu.wait_dma2 semaphore(%268 : memref<!tpu.dma_semaphore, #tpu.memory_space<semaphore_mem>>) src(%265 : memref<1x128xf32, #tpu.memory_space<any>>) dst(%266 : memref<1x128xf32, #tpu.memory_space<vmem>>)
    %c13_i32_172 = arith.constant 13 : i32
    %c0_i32_173 = arith.constant 0 : i32
    %269 = tpu.memref_slice %arg2[%90, %c0_i32_173] : memref<128x128xf32, #tpu.memory_space<any>> -> memref<1x128xf32, #tpu.memory_space<any>>
    %c29_i32_174 = arith.constant 29 : i32
    %c0_i32_175 = arith.constant 0 : i32
    %270 = tpu.memref_slice %arg3[%c29_i32_174, %c0_i32_175] : memref<32x128xf32, #tpu.memory_space<vmem>> -> memref<1x128xf32, #tpu.memory_space<vmem>>
    %271 = tpu.memref_slice %arg4[%c13_i32_172] : memref<16x!tpu.dma_semaphore, #tpu.memory_space<semaphore_mem>> -> memref<1x!tpu.dma_semaphore, #tpu.memory_space<semaphore_mem>>
    %272 = tpu.memref_squeeze %271 : memref<1x!tpu.dma_semaphore, #tpu.memory_space<semaphore_mem>> -> memref<!tpu.dma_semaphore, #tpu.memory_space<semaphore_mem>>
    tpu.enqueue_dma source(%269 : memref<1x128xf32, #tpu.memory_space<any>>) target(%270 : memref<1x128xf32, #tpu.memory_space<vmem>>) target_semaphore(%272 : memref<!tpu.dma_semaphore, #tpu.memory_space<semaphore_mem>>)
    %c14_i32_176 = arith.constant 14 : i32
    %c0_i32_177 = arith.constant 0 : i32
    %273 = tpu.memref_slice %arg2[%45, %c0_i32_177] : memref<128x128xf32, #tpu.memory_space<any>> -> memref<1x128xf32, #tpu.memory_space<any>>
    %c14_i32_178 = arith.constant 14 : i32
    %c0_i32_179 = arith.constant 0 : i32
    %274 = tpu.memref_slice %arg3[%c14_i32_178, %c0_i32_179] : memref<32x128xf32, #tpu.memory_space<vmem>> -> memref<1x128xf32, #tpu.memory_space<vmem>>
    %275 = tpu.memref_slice %arg4[%c14_i32_176] : memref<16x!tpu.dma_semaphore, #tpu.memory_space<semaphore_mem>> -> memref<1x!tpu.dma_semaphore, #tpu.memory_space<semaphore_mem>>
    %276 = tpu.memref_squeeze %275 : memref<1x!tpu.dma_semaphore, #tpu.memory_space<semaphore_mem>> -> memref<!tpu.dma_semaphore, #tpu.memory_space<semaphore_mem>>
    tpu.wait_dma2 semaphore(%276 : memref<!tpu.dma_semaphore, #tpu.memory_space<semaphore_mem>>) src(%273 : memref<1x128xf32, #tpu.memory_space<any>>) dst(%274 : memref<1x128xf32, #tpu.memory_space<vmem>>)
    %c14_i32_180 = arith.constant 14 : i32
    %c0_i32_181 = arith.constant 0 : i32
    %277 = tpu.memref_slice %arg2[%93, %c0_i32_181] : memref<128x128xf32, #tpu.memory_space<any>> -> memref<1x128xf32, #tpu.memory_space<any>>
    %c30_i32_182 = arith.constant 30 : i32
    %c0_i32_183 = arith.constant 0 : i32
    %278 = tpu.memref_slice %arg3[%c30_i32_182, %c0_i32_183] : memref<32x128xf32, #tpu.memory_space<vmem>> -> memref<1x128xf32, #tpu.memory_space<vmem>>
    %279 = tpu.memref_slice %arg4[%c14_i32_180] : memref<16x!tpu.dma_semaphore, #tpu.memory_space<semaphore_mem>> -> memref<1x!tpu.dma_semaphore, #tpu.memory_space<semaphore_mem>>
    %280 = tpu.memref_squeeze %279 : memref<1x!tpu.dma_semaphore, #tpu.memory_space<semaphore_mem>> -> memref<!tpu.dma_semaphore, #tpu.memory_space<semaphore_mem>>
    tpu.enqueue_dma source(%277 : memref<1x128xf32, #tpu.memory_space<any>>) target(%278 : memref<1x128xf32, #tpu.memory_space<vmem>>) target_semaphore(%280 : memref<!tpu.dma_semaphore, #tpu.memory_space<semaphore_mem>>)
    %c15_i32_184 = arith.constant 15 : i32
    %c0_i32_185 = arith.constant 0 : i32
    %281 = tpu.memref_slice %arg2[%48, %c0_i32_185] : memref<128x128xf32, #tpu.memory_space<any>> -> memref<1x128xf32, #tpu.memory_space<any>>
    %c15_i32_186 = arith.constant 15 : i32
    %c0_i32_187 = arith.constant 0 : i32
    %282 = tpu.memref_slice %arg3[%c15_i32_186, %c0_i32_187] : memref<32x128xf32, #tpu.memory_space<vmem>> -> memref<1x128xf32, #tpu.memory_space<vmem>>
    %283 = tpu.memref_slice %arg4[%c15_i32_184] : memref<16x!tpu.dma_semaphore, #tpu.memory_space<semaphore_mem>> -> memref<1x!tpu.dma_semaphore, #tpu.memory_space<semaphore_mem>>
    %284 = tpu.memref_squeeze %283 : memref<1x!tpu.dma_semaphore, #tpu.memory_space<semaphore_mem>> -> memref<!tpu.dma_semaphore, #tpu.memory_space<semaphore_mem>>
    tpu.wait_dma2 semaphore(%284 : memref<!tpu.dma_semaphore, #tpu.memory_space<semaphore_mem>>) src(%281 : memref<1x128xf32, #tpu.memory_space<any>>) dst(%282 : memref<1x128xf32, #tpu.memory_space<vmem>>)
    %c15_i32_188 = arith.constant 15 : i32
    %c0_i32_189 = arith.constant 0 : i32
    %285 = tpu.memref_slice %arg2[%96, %c0_i32_189] : memref<128x128xf32, #tpu.memory_space<any>> -> memref<1x128xf32, #tpu.memory_space<any>>
    %c31_i32_190 = arith.constant 31 : i32
    %c0_i32_191 = arith.constant 0 : i32
    %286 = tpu.memref_slice %arg3[%c31_i32_190, %c0_i32_191] : memref<32x128xf32, #tpu.memory_space<vmem>> -> memref<1x128xf32, #tpu.memory_space<vmem>>
    %287 = tpu.memref_slice %arg4[%c15_i32_188] : memref<16x!tpu.dma_semaphore, #tpu.memory_space<semaphore_mem>> -> memref<1x!tpu.dma_semaphore, #tpu.memory_space<semaphore_mem>>
    %288 = tpu.memref_squeeze %287 : memref<1x!tpu.dma_semaphore, #tpu.memory_space<semaphore_mem>> -> memref<!tpu.dma_semaphore, #tpu.memory_space<semaphore_mem>>
    tpu.enqueue_dma source(%285 : memref<1x128xf32, #tpu.memory_space<any>>) target(%286 : memref<1x128xf32, #tpu.memory_space<vmem>>) target_semaphore(%288 : memref<!tpu.dma_semaphore, #tpu.memory_space<semaphore_mem>>)
    %c0_i32_192 = arith.constant 0 : i32
    %c0_i32_193 = arith.constant 0 : i32
    %289 = tpu.memref_slice %arg2[%51, %c0_i32_193] : memref<128x128xf32, #tpu.memory_space<any>> -> memref<1x128xf32, #tpu.memory_space<any>>
    %c16_i32_194 = arith.constant 16 : i32
    %c0_i32_195 = arith.constant 0 : i32
    %290 = tpu.memref_slice %arg3[%c16_i32_194, %c0_i32_195] : memref<32x128xf32, #tpu.memory_space<vmem>> -> memref<1x128xf32, #tpu.memory_space<vmem>>
    %291 = tpu.memref_slice %arg4[%c0_i32_192] : memref<16x!tpu.dma_semaphore, #tpu.memory_space<semaphore_mem>> -> memref<1x!tpu.dma_semaphore, #tpu.memory_space<semaphore_mem>>
    %292 = tpu.memref_squeeze %291 : memref<1x!tpu.dma_semaphore, #tpu.memory_space<semaphore_mem>> -> memref<!tpu.dma_semaphore, #tpu.memory_space<semaphore_mem>>
    tpu.wait_dma2 semaphore(%292 : memref<!tpu.dma_semaphore, #tpu.memory_space<semaphore_mem>>) src(%289 : memref<1x128xf32, #tpu.memory_space<any>>) dst(%290 : memref<1x128xf32, #tpu.memory_space<vmem>>)
    %c1_i32_196 = arith.constant 1 : i32
    %c0_i32_197 = arith.constant 0 : i32
    %293 = tpu.memref_slice %arg2[%54, %c0_i32_197] : memref<128x128xf32, #tpu.memory_space<any>> -> memref<1x128xf32, #tpu.memory_space<any>>
    %c17_i32_198 = arith.constant 17 : i32
    %c0_i32_199 = arith.constant 0 : i32
    %294 = tpu.memref_slice %arg3[%c17_i32_198, %c0_i32_199] : memref<32x128xf32, #tpu.memory_space<vmem>> -> memref<1x128xf32, #tpu.memory_space<vmem>>
    %295 = tpu.memref_slice %arg4[%c1_i32_196] : memref<16x!tpu.dma_semaphore, #tpu.memory_space<semaphore_mem>> -> memref<1x!tpu.dma_semaphore, #tpu.memory_space<semaphore_mem>>
    %296 = tpu.memref_squeeze %295 : memref<1x!tpu.dma_semaphore, #tpu.memory_space<semaphore_mem>> -> memref<!tpu.dma_semaphore, #tpu.memory_space<semaphore_mem>>
    tpu.wait_dma2 semaphore(%296 : memref<!tpu.dma_semaphore, #tpu.memory_space<semaphore_mem>>) src(%293 : memref<1x128xf32, #tpu.memory_space<any>>) dst(%294 : memref<1x128xf32, #tpu.memory_space<vmem>>)
    %c2_i32_200 = arith.constant 2 : i32
    %c0_i32_201 = arith.constant 0 : i32
    %297 = tpu.memref_slice %arg2[%57, %c0_i32_201] : memref<128x128xf32, #tpu.memory_space<any>> -> memref<1x128xf32, #tpu.memory_space<any>>
    %c18_i32_202 = arith.constant 18 : i32
    %c0_i32_203 = arith.constant 0 : i32
    %298 = tpu.memref_slice %arg3[%c18_i32_202, %c0_i32_203] : memref<32x128xf32, #tpu.memory_space<vmem>> -> memref<1x128xf32, #tpu.memory_space<vmem>>
    %299 = tpu.memref_slice %arg4[%c2_i32_200] : memref<16x!tpu.dma_semaphore, #tpu.memory_space<semaphore_mem>> -> memref<1x!tpu.dma_semaphore, #tpu.memory_space<semaphore_mem>>
    %300 = tpu.memref_squeeze %299 : memref<1x!tpu.dma_semaphore, #tpu.memory_space<semaphore_mem>> -> memref<!tpu.dma_semaphore, #tpu.memory_space<semaphore_mem>>
    tpu.wait_dma2 semaphore(%300 : memref<!tpu.dma_semaphore, #tpu.memory_space<semaphore_mem>>) src(%297 : memref<1x128xf32, #tpu.memory_space<any>>) dst(%298 : memref<1x128xf32, #tpu.memory_space<vmem>>)
    %c3_i32_204 = arith.constant 3 : i32
    %c0_i32_205 = arith.constant 0 : i32
    %301 = tpu.memref_slice %arg2[%60, %c0_i32_205] : memref<128x128xf32, #tpu.memory_space<any>> -> memref<1x128xf32, #tpu.memory_space<any>>
    %c19_i32_206 = arith.constant 19 : i32
    %c0_i32_207 = arith.constant 0 : i32
    %302 = tpu.memref_slice %arg3[%c19_i32_206, %c0_i32_207] : memref<32x128xf32, #tpu.memory_space<vmem>> -> memref<1x128xf32, #tpu.memory_space<vmem>>
    %303 = tpu.memref_slice %arg4[%c3_i32_204] : memref<16x!tpu.dma_semaphore, #tpu.memory_space<semaphore_mem>> -> memref<1x!tpu.dma_semaphore, #tpu.memory_space<semaphore_mem>>
    %304 = tpu.memref_squeeze %303 : memref<1x!tpu.dma_semaphore, #tpu.memory_space<semaphore_mem>> -> memref<!tpu.dma_semaphore, #tpu.memory_space<semaphore_mem>>
    tpu.wait_dma2 semaphore(%304 : memref<!tpu.dma_semaphore, #tpu.memory_space<semaphore_mem>>) src(%301 : memref<1x128xf32, #tpu.memory_space<any>>) dst(%302 : memref<1x128xf32, #tpu.memory_space<vmem>>)
    %c4_i32_208 = arith.constant 4 : i32
    %c0_i32_209 = arith.constant 0 : i32
    %305 = tpu.memref_slice %arg2[%63, %c0_i32_209] : memref<128x128xf32, #tpu.memory_space<any>> -> memref<1x128xf32, #tpu.memory_space<any>>
    %c20_i32_210 = arith.constant 20 : i32
    %c0_i32_211 = arith.constant 0 : i32
    %306 = tpu.memref_slice %arg3[%c20_i32_210, %c0_i32_211] : memref<32x128xf32, #tpu.memory_space<vmem>> -> memref<1x128xf32, #tpu.memory_space<vmem>>
    %307 = tpu.memref_slice %arg4[%c4_i32_208] : memref<16x!tpu.dma_semaphore, #tpu.memory_space<semaphore_mem>> -> memref<1x!tpu.dma_semaphore, #tpu.memory_space<semaphore_mem>>
    %308 = tpu.memref_squeeze %307 : memref<1x!tpu.dma_semaphore, #tpu.memory_space<semaphore_mem>> -> memref<!tpu.dma_semaphore, #tpu.memory_space<semaphore_mem>>
    tpu.wait_dma2 semaphore(%308 : memref<!tpu.dma_semaphore, #tpu.memory_space<semaphore_mem>>) src(%305 : memref<1x128xf32, #tpu.memory_space<any>>) dst(%306 : memref<1x128xf32, #tpu.memory_space<vmem>>)
    %c5_i32_212 = arith.constant 5 : i32
    %c0_i32_213 = arith.constant 0 : i32
    %309 = tpu.memref_slice %arg2[%66, %c0_i32_213] : memref<128x128xf32, #tpu.memory_space<any>> -> memref<1x128xf32, #tpu.memory_space<any>>
    %c21_i32_214 = arith.constant 21 : i32
    %c0_i32_215 = arith.constant 0 : i32
    %310 = tpu.memref_slice %arg3[%c21_i32_214, %c0_i32_215] : memref<32x128xf32, #tpu.memory_space<vmem>> -> memref<1x128xf32, #tpu.memory_space<vmem>>
    %311 = tpu.memref_slice %arg4[%c5_i32_212] : memref<16x!tpu.dma_semaphore, #tpu.memory_space<semaphore_mem>> -> memref<1x!tpu.dma_semaphore, #tpu.memory_space<semaphore_mem>>
    %312 = tpu.memref_squeeze %311 : memref<1x!tpu.dma_semaphore, #tpu.memory_space<semaphore_mem>> -> memref<!tpu.dma_semaphore, #tpu.memory_space<semaphore_mem>>
    tpu.wait_dma2 semaphore(%312 : memref<!tpu.dma_semaphore, #tpu.memory_space<semaphore_mem>>) src(%309 : memref<1x128xf32, #tpu.memory_space<any>>) dst(%310 : memref<1x128xf32, #tpu.memory_space<vmem>>)
    %c6_i32_216 = arith.constant 6 : i32
    %c0_i32_217 = arith.constant 0 : i32
    %313 = tpu.memref_slice %arg2[%69, %c0_i32_217] : memref<128x128xf32, #tpu.memory_space<any>> -> memref<1x128xf32, #tpu.memory_space<any>>
    %c22_i32_218 = arith.constant 22 : i32
    %c0_i32_219 = arith.constant 0 : i32
    %314 = tpu.memref_slice %arg3[%c22_i32_218, %c0_i32_219] : memref<32x128xf32, #tpu.memory_space<vmem>> -> memref<1x128xf32, #tpu.memory_space<vmem>>
    %315 = tpu.memref_slice %arg4[%c6_i32_216] : memref<16x!tpu.dma_semaphore, #tpu.memory_space<semaphore_mem>> -> memref<1x!tpu.dma_semaphore, #tpu.memory_space<semaphore_mem>>
    %316 = tpu.memref_squeeze %315 : memref<1x!tpu.dma_semaphore, #tpu.memory_space<semaphore_mem>> -> memref<!tpu.dma_semaphore, #tpu.memory_space<semaphore_mem>>
    tpu.wait_dma2 semaphore(%316 : memref<!tpu.dma_semaphore, #tpu.memory_space<semaphore_mem>>) src(%313 : memref<1x128xf32, #tpu.memory_space<any>>) dst(%314 : memref<1x128xf32, #tpu.memory_space<vmem>>)
    %c7_i32_220 = arith.constant 7 : i32
    %c0_i32_221 = arith.constant 0 : i32
    %317 = tpu.memref_slice %arg2[%72, %c0_i32_221] : memref<128x128xf32, #tpu.memory_space<any>> -> memref<1x128xf32, #tpu.memory_space<any>>
    %c23_i32_222 = arith.constant 23 : i32
    %c0_i32_223 = arith.constant 0 : i32
    %318 = tpu.memref_slice %arg3[%c23_i32_222, %c0_i32_223] : memref<32x128xf32, #tpu.memory_space<vmem>> -> memref<1x128xf32, #tpu.memory_space<vmem>>
    %319 = tpu.memref_slice %arg4[%c7_i32_220] : memref<16x!tpu.dma_semaphore, #tpu.memory_space<semaphore_mem>> -> memref<1x!tpu.dma_semaphore, #tpu.memory_space<semaphore_mem>>
    %320 = tpu.memref_squeeze %319 : memref<1x!tpu.dma_semaphore, #tpu.memory_space<semaphore_mem>> -> memref<!tpu.dma_semaphore, #tpu.memory_space<semaphore_mem>>
    tpu.wait_dma2 semaphore(%320 : memref<!tpu.dma_semaphore, #tpu.memory_space<semaphore_mem>>) src(%317 : memref<1x128xf32, #tpu.memory_space<any>>) dst(%318 : memref<1x128xf32, #tpu.memory_space<vmem>>)
    %c8_i32_224 = arith.constant 8 : i32
    %c0_i32_225 = arith.constant 0 : i32
    %321 = tpu.memref_slice %arg2[%75, %c0_i32_225] : memref<128x128xf32, #tpu.memory_space<any>> -> memref<1x128xf32, #tpu.memory_space<any>>
    %c24_i32_226 = arith.constant 24 : i32
    %c0_i32_227 = arith.constant 0 : i32
    %322 = tpu.memref_slice %arg3[%c24_i32_226, %c0_i32_227] : memref<32x128xf32, #tpu.memory_space<vmem>> -> memref<1x128xf32, #tpu.memory_space<vmem>>
    %323 = tpu.memref_slice %arg4[%c8_i32_224] : memref<16x!tpu.dma_semaphore, #tpu.memory_space<semaphore_mem>> -> memref<1x!tpu.dma_semaphore, #tpu.memory_space<semaphore_mem>>
    %324 = tpu.memref_squeeze %323 : memref<1x!tpu.dma_semaphore, #tpu.memory_space<semaphore_mem>> -> memref<!tpu.dma_semaphore, #tpu.memory_space<semaphore_mem>>
    tpu.wait_dma2 semaphore(%324 : memref<!tpu.dma_semaphore, #tpu.memory_space<semaphore_mem>>) src(%321 : memref<1x128xf32, #tpu.memory_space<any>>) dst(%322 : memref<1x128xf32, #tpu.memory_space<vmem>>)
    %c9_i32_228 = arith.constant 9 : i32
    %c0_i32_229 = arith.constant 0 : i32
    %325 = tpu.memref_slice %arg2[%78, %c0_i32_229] : memref<128x128xf32, #tpu.memory_space<any>> -> memref<1x128xf32, #tpu.memory_space<any>>
    %c25_i32_230 = arith.constant 25 : i32
    %c0_i32_231 = arith.constant 0 : i32
    %326 = tpu.memref_slice %arg3[%c25_i32_230, %c0_i32_231] : memref<32x128xf32, #tpu.memory_space<vmem>> -> memref<1x128xf32, #tpu.memory_space<vmem>>
    %327 = tpu.memref_slice %arg4[%c9_i32_228] : memref<16x!tpu.dma_semaphore, #tpu.memory_space<semaphore_mem>> -> memref<1x!tpu.dma_semaphore, #tpu.memory_space<semaphore_mem>>
    %328 = tpu.memref_squeeze %327 : memref<1x!tpu.dma_semaphore, #tpu.memory_space<semaphore_mem>> -> memref<!tpu.dma_semaphore, #tpu.memory_space<semaphore_mem>>
    tpu.wait_dma2 semaphore(%328 : memref<!tpu.dma_semaphore, #tpu.memory_space<semaphore_mem>>) src(%325 : memref<1x128xf32, #tpu.memory_space<any>>) dst(%326 : memref<1x128xf32, #tpu.memory_space<vmem>>)
    %c10_i32_232 = arith.constant 10 : i32
    %c0_i32_233 = arith.constant 0 : i32
    %329 = tpu.memref_slice %arg2[%81, %c0_i32_233] : memref<128x128xf32, #tpu.memory_space<any>> -> memref<1x128xf32, #tpu.memory_space<any>>
    %c26_i32_234 = arith.constant 26 : i32
    %c0_i32_235 = arith.constant 0 : i32
    %330 = tpu.memref_slice %arg3[%c26_i32_234, %c0_i32_235] : memref<32x128xf32, #tpu.memory_space<vmem>> -> memref<1x128xf32, #tpu.memory_space<vmem>>
    %331 = tpu.memref_slice %arg4[%c10_i32_232] : memref<16x!tpu.dma_semaphore, #tpu.memory_space<semaphore_mem>> -> memref<1x!tpu.dma_semaphore, #tpu.memory_space<semaphore_mem>>
    %332 = tpu.memref_squeeze %331 : memref<1x!tpu.dma_semaphore, #tpu.memory_space<semaphore_mem>> -> memref<!tpu.dma_semaphore, #tpu.memory_space<semaphore_mem>>
    tpu.wait_dma2 semaphore(%332 : memref<!tpu.dma_semaphore, #tpu.memory_space<semaphore_mem>>) src(%329 : memref<1x128xf32, #tpu.memory_space<any>>) dst(%330 : memref<1x128xf32, #tpu.memory_space<vmem>>)
    %c11_i32_236 = arith.constant 11 : i32
    %c0_i32_237 = arith.constant 0 : i32
    %333 = tpu.memref_slice %arg2[%84, %c0_i32_237] : memref<128x128xf32, #tpu.memory_space<any>> -> memref<1x128xf32, #tpu.memory_space<any>>
    %c27_i32_238 = arith.constant 27 : i32
    %c0_i32_239 = arith.constant 0 : i32
    %334 = tpu.memref_slice %arg3[%c27_i32_238, %c0_i32_239] : memref<32x128xf32, #tpu.memory_space<vmem>> -> memref<1x128xf32, #tpu.memory_space<vmem>>
    %335 = tpu.memref_slice %arg4[%c11_i32_236] : memref<16x!tpu.dma_semaphore, #tpu.memory_space<semaphore_mem>> -> memref<1x!tpu.dma_semaphore, #tpu.memory_space<semaphore_mem>>
    %336 = tpu.memref_squeeze %335 : memref<1x!tpu.dma_semaphore, #tpu.memory_space<semaphore_mem>> -> memref<!tpu.dma_semaphore, #tpu.memory_space<semaphore_mem>>
    tpu.wait_dma2 semaphore(%336 : memref<!tpu.dma_semaphore, #tpu.memory_space<semaphore_mem>>) src(%333 : memref<1x128xf32, #tpu.memory_space<any>>) dst(%334 : memref<1x128xf32, #tpu.memory_space<vmem>>)
    %c12_i32_240 = arith.constant 12 : i32
    %c0_i32_241 = arith.constant 0 : i32
    %337 = tpu.memref_slice %arg2[%87, %c0_i32_241] : memref<128x128xf32, #tpu.memory_space<any>> -> memref<1x128xf32, #tpu.memory_space<any>>
    %c28_i32_242 = arith.constant 28 : i32
    %c0_i32_243 = arith.constant 0 : i32
    %338 = tpu.memref_slice %arg3[%c28_i32_242, %c0_i32_243] : memref<32x128xf32, #tpu.memory_space<vmem>> -> memref<1x128xf32, #tpu.memory_space<vmem>>
    %339 = tpu.memref_slice %arg4[%c12_i32_240] : memref<16x!tpu.dma_semaphore, #tpu.memory_space<semaphore_mem>> -> memref<1x!tpu.dma_semaphore, #tpu.memory_space<semaphore_mem>>
    %340 = tpu.memref_squeeze %339 : memref<1x!tpu.dma_semaphore, #tpu.memory_space<semaphore_mem>> -> memref<!tpu.dma_semaphore, #tpu.memory_space<semaphore_mem>>
    tpu.wait_dma2 semaphore(%340 : memref<!tpu.dma_semaphore, #tpu.memory_space<semaphore_mem>>) src(%337 : memref<1x128xf32, #tpu.memory_space<any>>) dst(%338 : memref<1x128xf32, #tpu.memory_space<vmem>>)
    %c13_i32_244 = arith.constant 13 : i32
    %c0_i32_245 = arith.constant 0 : i32
    %341 = tpu.memref_slice %arg2[%90, %c0_i32_245] : memref<128x128xf32, #tpu.memory_space<any>> -> memref<1x128xf32, #tpu.memory_space<any>>
    %c29_i32_246 = arith.constant 29 : i32
    %c0_i32_247 = arith.constant 0 : i32
    %342 = tpu.memref_slice %arg3[%c29_i32_246, %c0_i32_247] : memref<32x128xf32, #tpu.memory_space<vmem>> -> memref<1x128xf32, #tpu.memory_space<vmem>>
    %343 = tpu.memref_slice %arg4[%c13_i32_244] : memref<16x!tpu.dma_semaphore, #tpu.memory_space<semaphore_mem>> -> memref<1x!tpu.dma_semaphore, #tpu.memory_space<semaphore_mem>>
    %344 = tpu.memref_squeeze %343 : memref<1x!tpu.dma_semaphore, #tpu.memory_space<semaphore_mem>> -> memref<!tpu.dma_semaphore, #tpu.memory_space<semaphore_mem>>
    tpu.wait_dma2 semaphore(%344 : memref<!tpu.dma_semaphore, #tpu.memory_space<semaphore_mem>>) src(%341 : memref<1x128xf32, #tpu.memory_space<any>>) dst(%342 : memref<1x128xf32, #tpu.memory_space<vmem>>)
    %c14_i32_248 = arith.constant 14 : i32
    %c0_i32_249 = arith.constant 0 : i32
    %345 = tpu.memref_slice %arg2[%93, %c0_i32_249] : memref<128x128xf32, #tpu.memory_space<any>> -> memref<1x128xf32, #tpu.memory_space<any>>
    %c30_i32_250 = arith.constant 30 : i32
    %c0_i32_251 = arith.constant 0 : i32
    %346 = tpu.memref_slice %arg3[%c30_i32_250, %c0_i32_251] : memref<32x128xf32, #tpu.memory_space<vmem>> -> memref<1x128xf32, #tpu.memory_space<vmem>>
    %347 = tpu.memref_slice %arg4[%c14_i32_248] : memref<16x!tpu.dma_semaphore, #tpu.memory_space<semaphore_mem>> -> memref<1x!tpu.dma_semaphore, #tpu.memory_space<semaphore_mem>>
    %348 = tpu.memref_squeeze %347 : memref<1x!tpu.dma_semaphore, #tpu.memory_space<semaphore_mem>> -> memref<!tpu.dma_semaphore, #tpu.memory_space<semaphore_mem>>
    tpu.wait_dma2 semaphore(%348 : memref<!tpu.dma_semaphore, #tpu.memory_space<semaphore_mem>>) src(%345 : memref<1x128xf32, #tpu.memory_space<any>>) dst(%346 : memref<1x128xf32, #tpu.memory_space<vmem>>)
    %c15_i32_252 = arith.constant 15 : i32
    %c0_i32_253 = arith.constant 0 : i32
    %349 = tpu.memref_slice %arg2[%96, %c0_i32_253] : memref<128x128xf32, #tpu.memory_space<any>> -> memref<1x128xf32, #tpu.memory_space<any>>
    %c31_i32_254 = arith.constant 31 : i32
    %c0_i32_255 = arith.constant 0 : i32
    %350 = tpu.memref_slice %arg3[%c31_i32_254, %c0_i32_255] : memref<32x128xf32, #tpu.memory_space<vmem>> -> memref<1x128xf32, #tpu.memory_space<vmem>>
    %351 = tpu.memref_slice %arg4[%c15_i32_252] : memref<16x!tpu.dma_semaphore, #tpu.memory_space<semaphore_mem>> -> memref<1x!tpu.dma_semaphore, #tpu.memory_space<semaphore_mem>>
    %352 = tpu.memref_squeeze %351 : memref<1x!tpu.dma_semaphore, #tpu.memory_space<semaphore_mem>> -> memref<!tpu.dma_semaphore, #tpu.memory_space<semaphore_mem>>
    tpu.wait_dma2 semaphore(%352 : memref<!tpu.dma_semaphore, #tpu.memory_space<semaphore_mem>>) src(%349 : memref<1x128xf32, #tpu.memory_space<any>>) dst(%350 : memref<1x128xf32, #tpu.memory_space<vmem>>)
    return
  }
  func.func @transform_1(%arg0: i32, %arg1: memref<32xi32, #tpu.memory_space<smem>>) -> (i32, i32) {
    %c0_i32 = arith.constant 0 : i32
    %c0_i32_0 = arith.constant 0 : i32
    return %arg0, %c0_i32 : i32, i32
  }
}

</mosaic_0001>

<bundles_post_ra>
// kernel: tpu_custom_call.1
= control target key start
LH: loop header
LB: loop body
LE: loop exit
PB: predicated region body
PF: predicated region fallthrough
CT: control target
= control target key end

     0   :  { %s2316_s0 = inlined_call_operand.hbm [shape: s32[32], index: 0, kind: input, shape index: {}]   ;;  %s2317_s1 = inlined_call_operand.hbm [shape: f32[128,128], index: 1, kind: input, shape index: {}]   ;;  %s2318_s2 = inlined_call_operand.hbm [shape: f32[32,128], index: 2, kind: output, shape index: {}]  }
   0x1   :  { %2320 = sst [smem:[#allocation111_spill]] %s2318_s2  ;;  %s908_s11 = scalar_lea.hbm %s2316_s0, 16 }
   0x2   :  { %p909_p0 = scmp.ne.s32.totalorder %s2316_s0, %s908_s11  ;;  %p912_p1 = scmp.lt.u32.totalorder %s908_s11, %s2316_s0 }
   0x4   :  { %p914_p2 = pnand %p912_p1, %p909_p0 }
   0x6   :  { %917 = shalt.err (!%p914_p2)  }
   0x7   :  { %s1776_s16 = smov [#allocation4]  }
   0x8   :  { %8 = dma.hbm_to_smem %s2316_s0, 16, %s1776_s16, [#allocation3] }
   0x9   :  { %1708 = dma.done.wait [#allocation3], 16 }
   0xa   :  { %1709 = vsyncadd [#allocation3], 4294967280 }
   0xb   :  { %10 = sfence }
   0xc   :  { %11 = vsyncpa [#allocation6], 0  ;;  %s13_s19 = sld [smem:[#allocation4]]  ;;  %s1840_s21 = sld [smem:[#allocation4 + $0x11]] }
   0xd   :  { %s1838_s20 = sld [smem:[#allocation4 + $0x10]]  ;;  %s1842_s22 = sld [smem:[#allocation4 + $0x12]] }
   0xe   :  { %s1844_s23 = sld [smem:[#allocation4 + $0x13]]  ;;  %s1846_s24 = sld [smem:[#allocation4 + $0x14]] }
   0xf   :  { %s1848_s25 = sld [smem:[#allocation4 + $0x15]]  ;;  %s1850_s26 = sld [smem:[#allocation4 + $0x16]] }
  0x10   :  { %s1852_s0 = sld [smem:[#allocation4 + $0x17]]  ;;  %s1854_s27 = sld [smem:[#allocation4 + $0x18]] }
  0x11   :  { %s1856_s28 = sld [smem:[#allocation4 + $0x19]]  ;;  %s1858_s29 = sld [smem:[#allocation4 + $0x1a]] }
  0x12   :  { %s1860_s30 = sld [smem:[#allocation4 + $0x1b]]  ;;  %s1862_s3 = sld [smem:[#allocation4 + $0x1c]] }
  0x13   :  { %s1864_s4 = sld [smem:[#allocation4 + $0x1d]]  ;;  %s1866_s5 = sld [smem:[#allocation4 + $0x1e]] }
  0x14   :  { %s1868_s6 = sld [smem:[#allocation4 + $0x1f]]  ;;  %s825_s7 = sshll.u32 %s13_s19, 4 }
  0x15   :  { %s77_s10 = scalar_lea.hbm %s2317_s1, %s825_s7  ;;  %s1777_s11 = smov [#allocation5]  }
  0x16   :  { %s85_s12 = sshll.u32 %s1777_s11, 4  ;;  %s1873_s13 = sld [smem:[#allocation4 + $0x1]]  ;;  %s1875_s12 = int_to_ptr.vmem [resolvable:$true] %s85_s12 }
  0x17   :  { %s918_s14 = scalar_lea.hbm %s77_s10, 16  ;;  %s1880_s17 = scalar_lea.hbm %s2317_s1, 2048 }
  0x18   :  { %2321 = sst [smem:[#allocation107_spill]] %s1862_s3  ;;  %p919_p3 = scmp.ne.s32.totalorder %s77_s10, %s918_s14 }
  0x19   :  { %2322 = sst [smem:[#allocation108_spill]] %s1864_s4  ;;  %p921_p4 = scmp.lt.u32.totalorder %s77_s10, %s2317_s1 }
  0x1a   :  { %2323 = sst [smem:[#allocation109_spill]] %s1866_s5  ;;  %p922_p5 = scmp.lt.u32.totalorder %s1880_s17, %s918_s14 }
  0x1b   :  { %2324 = sst [smem:[#allocation110_spill]] %s1868_s6  ;;  %p924_p7 = scmp.lt.u32.totalorder %s918_s14, %s77_s10 }
  0x1c   :  { %p923_p6 = por %p922_p5, %p921_p4 }
  0x1e   :  { %p925_p8 = por %p924_p7, %p923_p6 }
  0x20   :  { %p926_p9 = pnand %p925_p8, %p919_p3 }
  0x22   :  { %929 = shalt.err (!%p926_p9)  }
  0x23   :  { %s930_s19 = scalar_lea.vmem %s1875_s12, 16  ;;  %s1889_s7 = scalar_lea.vmem %s1875_s12, 512 }
  0x24   :  { %p931_p10 = scmp.ne.s32.totalorder %s1875_s12, %s930_s19  ;;  %p935_p11 = scmp.lt.s32.totalorder %s1875_s12, %s1875_s12 }
  0x25   :  { %p936_p12 = scmp.lt.s32.totalorder %s1889_s7, %s930_s19 }
  0x27   :  { %p937_p13 = por %p936_p12, %p935_p11 }
  0x29   :  { %p938_p0 = pnand %p937_p13, %p931_p10 }
  0x2b   :  { %941 = shalt.err (!%p938_p0)  }
  0x2c   :  { %88 = dma.hbm_to_vmem [thread:$0]  %s77_s10, 16, %s1875_s12, [#allocation2] }
  0x2d   :  { %s1778_s2 = smov [#allocation5 + $0x1]   ;;  %s1898_s9 = sld [smem:[#allocation4 + $0x2]] }
  0x2e   :  { %s100_s8 = sshll.u32 %s1778_s2, 4  ;;  %s1779_s11 = smov [#allocation5 + $0x2]   ;;  %s101_s8 = int_to_ptr.vmem [resolvable:$true] %s100_s8 }
  0x2f   :  { %s115_s14 = sshll.u32 %s1779_s11, 4  ;;  %s1900_s15 = sld [smem:[#allocation4 + $0x3]]  ;;  %s1903_s14 = int_to_ptr.vmem [resolvable:$true] %s115_s14 }
  0x30   :  { %s826_s16 = sshll.u32 %s1873_s13, 4 }
  0x31   :  { %s90_s6 = scalar_lea.hbm %s2317_s1, %s826_s16 }
  0x32   :  { %s942_s5 = scalar_lea.hbm %s90_s6, 16  ;;  %p945_p2 = scmp.lt.u32.totalorder %s90_s6, %s2317_s1 }
  0x33   :  { %p943_p1 = scmp.ne.s32.totalorder %s90_s6, %s942_s5  ;;  %p946_p3 = scmp.lt.u32.totalorder %s1880_s17, %s942_s5 }
  0x34   :  { %p948_p5 = scmp.lt.u32.totalorder %s942_s5, %s90_s6 }
  0x35   :  { %p947_p4 = por %p946_p3, %p945_p2 }
  0x37   :  { %p949_p6 = por %p948_p5, %p947_p4 }
  0x39   :  { %p950_p7 = pnand %p949_p6, %p943_p1 }
  0x3b   :  { %953 = shalt.err (!%p950_p7)  }
  0x3c   :  { %s954_s2 = scalar_lea.vmem %s101_s8, 16  ;;  %p959_p9 = scmp.lt.s32.totalorder %s101_s8, %s1875_s12 }
  0x3d   :  { %p955_p8 = scmp.ne.s32.totalorder %s101_s8, %s954_s2  ;;  %p960_p10 = scmp.lt.s32.totalorder %s1889_s7, %s954_s2 }
  0x3f   :  { %p961_p12 = por %p960_p10, %p959_p9 }
  0x41   :  { %p962_p13 = pnand %p961_p12, %p955_p8 }
  0x43   :  { %965 = shalt.err (!%p962_p13)  }
  0x44   :  { %103 = dma.hbm_to_vmem [thread:$0]  %s90_s6, 16, %s101_s8, [#allocation2 + $0x1] }
  0x45   :  { %s827_s4 = sshll.u32 %s1898_s9, 4  ;;  %s1780_s13 = smov [#allocation5 + $0x3]  }
  0x46   :  { %s130_s11 = sshll.u32 %s1780_s13, 4  ;;  %s105_s18 = scalar_lea.hbm %s2317_s1, %s827_s4  ;;  %s1918_s11 = int_to_ptr.vmem [resolvable:$true] %s130_s11 }
  0x47   :  { %s966_s19 = scalar_lea.hbm %s105_s18, 16  ;;  %p969_p1 = scmp.lt.u32.totalorder %s105_s18, %s2317_s1 }
  0x48   :  { %p967_p0 = scmp.ne.s32.totalorder %s105_s18, %s966_s19  ;;  %p970_p2 = scmp.lt.u32.totalorder %s1880_s17, %s966_s19 }
  0x49   :  { %p972_p4 = scmp.lt.u32.totalorder %s966_s19, %s105_s18 }
  0x4a   :  { %p971_p3 = por %p970_p2, %p969_p1 }
  0x4c   :  { %p973_p5 = por %p972_p4, %p971_p3 }
  0x4e   :  { %p974_p6 = pnand %p973_p5, %p967_p0 }
  0x50   :  { %977 = shalt.err (!%p974_p6)  }
  0x51   :  { %s978_s6 = scalar_lea.vmem %s1903_s14, 16  ;;  %p983_p8 = scmp.lt.s32.totalorder %s1903_s14, %s1875_s12 }
  0x52   :  { %p979_p7 = scmp.ne.s32.totalorder %s1903_s14, %s978_s6  ;;  %p984_p9 = scmp.lt.s32.totalorder %s1889_s7, %s978_s6 }
  0x54   :  { %p985_p10 = por %p984_p9, %p983_p8 }
  0x56   :  { %p986_p12 = pnand %p985_p10, %p979_p7 }
  0x58   :  { %989 = shalt.err (!%p986_p12)  }
  0x59   :  { %118 = dma.hbm_to_vmem [thread:$0]  %s105_s18, 16, %s1903_s14, [#allocation2 + $0x2] }
  0x5a   :  { %s828_s3 = sshll.u32 %s1900_s15, 4  ;;  %s1931_s8 = sld [smem:[#allocation4 + $0x4]] }
  0x5b   :  { %s120_s4 = scalar_lea.hbm %s2317_s1, %s828_s3 }
  0x5c   :  { %s990_s13 = scalar_lea.hbm %s120_s4, 16  ;;  %p993_p0 = scmp.lt.u32.totalorder %s120_s4, %s2317_s1 }
  0x5d   :  { %p991_p13 = scmp.ne.s32.totalorder %s120_s4, %s990_s13  ;;  %p994_p1 = scmp.lt.u32.totalorder %s1880_s17, %s990_s13 }
  0x5e   :  { %p996_p3 = scmp.lt.u32.totalorder %s990_s13, %s120_s4 }
  0x5f   :  { %p995_p2 = por %p994_p1, %p993_p0 }
  0x61   :  { %p997_p4 = por %p996_p3, %p995_p2 }
  0x63   :  { %p998_p5 = pnand %p997_p4, %p991_p13 }
  0x65   :  { %1001 = shalt.err (!%p998_p5)  }
  0x66   :  { %s1002_s14 = scalar_lea.vmem %s1918_s11, 16  ;;  %p1007_p7 = scmp.lt.s32.totalorder %s1918_s11, %s1875_s12 }
  0x67   :  { %p1003_p6 = scmp.ne.s32.totalorder %s1918_s11, %s1002_s14  ;;  %p1008_p8 = scmp.lt.s32.totalorder %s1889_s7, %s1002_s14 }
  0x69   :  { %p1009_p9 = por %p1008_p8, %p1007_p7 }
  0x6b   :  { %p1010_p10 = pnand %p1009_p9, %p1003_p6 }
  0x6d   :  { %1013 = shalt.err (!%p1010_p10)  }
  0x6e   :  { %133 = dma.hbm_to_vmem [thread:$0]  %s120_s4, 16, %s1918_s11, [#allocation2 + $0x3] }
  0x6f   :  { %s1781_s15 = smov [#allocation5 + $0x4]   ;;  %s1946_s19 = sld [smem:[#allocation4 + $0x5]] }
  0x70   :  { %s145_s18 = sshll.u32 %s1781_s15, 4  ;;  %s1782_s10 = smov [#allocation5 + $0x5]   ;;  %s146_s18 = int_to_ptr.vmem [resolvable:$true] %s145_s18 }
  0x71   :  { %s160_s6 = sshll.u32 %s1782_s10, 4  ;;  %s1948_s3 = sld [smem:[#allocation4 + $0x6]]  ;;  %s1951_s6 = int_to_ptr.vmem [resolvable:$true] %s160_s6 }
  0x72   :  { %s829_s9 = sshll.u32 %s1931_s8, 4 }
  0x73   :  { %s135_s16 = scalar_lea.hbm %s2317_s1, %s829_s9 }
  0x74   :  { %s1014_s5 = scalar_lea.hbm %s135_s16, 16  ;;  %p1017_p13 = scmp.lt.u32.totalorder %s135_s16, %s2317_s1 }
  0x75   :  { %p1015_p12 = scmp.ne.s32.totalorder %s135_s16, %s1014_s5  ;;  %p1018_p0 = scmp.lt.u32.totalorder %s1880_s17, %s1014_s5 }
  0x76   :  { %p1020_p2 = scmp.lt.u32.totalorder %s1014_s5, %s135_s16 }
  0x77   :  { %p1019_p1 = por %p1018_p0, %p1017_p13 }
  0x79   :  { %p1021_p3 = por %p1020_p2, %p1019_p1 }
  0x7b   :  { %p1022_p4 = pnand %p1021_p3, %p1015_p12 }
  0x7d   :  { %1025 = shalt.err (!%p1022_p4)  }
  0x7e   :  { %s1026_s4 = scalar_lea.vmem %s146_s18, 16  ;;  %p1031_p6 = scmp.lt.s32.totalorder %s146_s18, %s1875_s12 }
  0x7f   :  { %p1027_p5 = scmp.ne.s32.totalorder %s146_s18, %s1026_s4  ;;  %p1032_p7 = scmp.lt.s32.totalorder %s1889_s7, %s1026_s4 }
  0x81   :  { %p1033_p8 = por %p1032_p7, %p1031_p6 }
  0x83   :  { %p1034_p9 = pnand %p1033_p8, %p1027_p5 }
  0x85   :  { %1037 = shalt.err (!%p1034_p9)  }
  0x86   :  { %148 = dma.hbm_to_vmem [thread:$0]  %s135_s16, 16, %s146_s18, [#allocation2 + $0x4] }
  0x87   :  { %s830_s8 = sshll.u32 %s1946_s19, 4  ;;  %s1783_s15 = smov [#allocation5 + $0x6]  }
  0x88   :  { %s175_s10 = sshll.u32 %s1783_s15, 4  ;;  %s150_s13 = scalar_lea.hbm %s2317_s1, %s830_s8  ;;  %s1966_s10 = int_to_ptr.vmem [resolvable:$true] %s175_s10 }
  0x89   :  { %s1038_s5 = scalar_lea.hbm %s150_s13, 16  ;;  %p1041_p12 = scmp.lt.u32.totalorder %s150_s13, %s2317_s1 }
  0x8a   :  { %p1039_p10 = scmp.ne.s32.totalorder %s150_s13, %s1038_s5  ;;  %p1042_p13 = scmp.lt.u32.totalorder %s1880_s17, %s1038_s5 }
  0x8b   :  { %p1044_p1 = scmp.lt.u32.totalorder %s1038_s5, %s150_s13 }
  0x8c   :  { %p1043_p0 = por %p1042_p13, %p1041_p12 }
  0x8e   :  { %p1045_p2 = por %p1044_p1, %p1043_p0 }
  0x90   :  { %p1046_p3 = pnand %p1045_p2, %p1039_p10 }
  0x92   :  { %1049 = shalt.err (!%p1046_p3)  }
  0x93   :  { %s1050_s18 = scalar_lea.vmem %s1951_s6, 16  ;;  %p1055_p5 = scmp.lt.s32.totalorder %s1951_s6, %s1875_s12 }
  0x94   :  { %p1051_p4 = scmp.ne.s32.totalorder %s1951_s6, %s1050_s18  ;;  %p1056_p6 = scmp.lt.s32.totalorder %s1889_s7, %s1050_s18 }
  0x96   :  { %p1057_p7 = por %p1056_p6, %p1055_p5 }
  0x98   :  { %p1058_p8 = pnand %p1057_p7, %p1051_p4 }
  0x9a   :  { %1061 = shalt.err (!%p1058_p8)  }
  0x9b   :  { %163 = dma.hbm_to_vmem [thread:$0]  %s150_s13, 16, %s1951_s6, [#allocation2 + $0x5] }
  0x9c   :  { %s831_s19 = sshll.u32 %s1948_s3, 4  ;;  %s1979_s16 = sld [smem:[#allocation4 + $0x7]] }
  0x9d   :  { %s165_s15 = scalar_lea.hbm %s2317_s1, %s831_s19 }
  0x9e   :  { %s1062_s9 = scalar_lea.hbm %s165_s15, 16  ;;  %p1065_p10 = scmp.lt.u32.totalorder %s165_s15, %s2317_s1 }
  0x9f   :  { %p1063_p9 = scmp.ne.s32.totalorder %s165_s15, %s1062_s9  ;;  %p1066_p12 = scmp.lt.u32.totalorder %s1880_s17, %s1062_s9 }
  0xa0   :  { %p1068_p0 = scmp.lt.u32.totalorder %s1062_s9, %s165_s15 }
  0xa1   :  { %p1067_p13 = por %p1066_p12, %p1065_p10 }
  0xa3   :  { %p1069_p1 = por %p1068_p0, %p1067_p13 }
  0xa5   :  { %p1070_p2 = pnand %p1069_p1, %p1063_p9 }
  0xa7   :  { %1073 = shalt.err (!%p1070_p2)  }
  0xa8   :  { %s1074_s6 = scalar_lea.vmem %s1966_s10, 16  ;;  %p1079_p4 = scmp.lt.s32.totalorder %s1966_s10, %s1875_s12 }
  0xa9   :  { %p1075_p3 = scmp.ne.s32.totalorder %s1966_s10, %s1074_s6  ;;  %p1080_p5 = scmp.lt.s32.totalorder %s1889_s7, %s1074_s6 }
  0xab   :  { %p1081_p6 = por %p1080_p5, %p1079_p4 }
  0xad   :  { %p1082_p7 = pnand %p1081_p6, %p1075_p3 }
  0xaf   :  { %1085 = shalt.err (!%p1082_p7)  }
  0xb0   :  { %178 = dma.hbm_to_vmem [thread:$0]  %s165_s15, 16, %s1966_s10, [#allocation2 + $0x6] }
  0xb1   :  { %s1784_s3 = smov [#allocation5 + $0x7]   ;;  %s1994_s14 = sld [smem:[#allocation4 + $0x8]] }
  0xb2   :  { %s190_s13 = sshll.u32 %s1784_s3, 4  ;;  %s1785_s11 = smov [#allocation5 + $0x8]   ;;  %s191_s13 = int_to_ptr.vmem [resolvable:$true] %s190_s13 }
  0xb3   :  { %s205_s18 = sshll.u32 %s1785_s11, 4  ;;  %s1996_s19 = sld [smem:[#allocation4 + $0x9]]  ;;  %s1999_s18 = int_to_ptr.vmem [resolvable:$true] %s205_s18 }
  0xb4   :  { %s832_s4 = sshll.u32 %s1979_s16, 4 }
  0xb5   :  { %s180_s2 = scalar_lea.hbm %s2317_s1, %s832_s4 }
  0xb6   :  { %s1086_s5 = scalar_lea.hbm %s180_s2, 16  ;;  %p1089_p9 = scmp.lt.u32.totalorder %s180_s2, %s2317_s1 }
  0xb7   :  { %p1087_p8 = scmp.ne.s32.totalorder %s180_s2, %s1086_s5  ;;  %p1090_p10 = scmp.lt.u32.totalorder %s1880_s17, %s1086_s5 }
  0xb8   :  { %p1092_p13 = scmp.lt.u32.totalorder %s1086_s5, %s180_s2 }
  0xb9   :  { %p1091_p12 = por %p1090_p10, %p1089_p9 }
  0xbb   :  { %p1093_p0 = por %p1092_p13, %p1091_p12 }
  0xbd   :  { %p1094_p1 = pnand %p1093_p0, %p1087_p8 }
  0xbf   :  { %1097 = shalt.err (!%p1094_p1)  }
  0xc0   :  { %s1098_s15 = scalar_lea.vmem %s191_s13, 16  ;;  %p1103_p3 = scmp.lt.s32.totalorder %s191_s13, %s1875_s12 }
  0xc1   :  { %p1099_p2 = scmp.ne.s32.totalorder %s191_s13, %s1098_s15  ;;  %p1104_p4 = scmp.lt.s32.totalorder %s1889_s7, %s1098_s15 }
  0xc3   :  { %p1105_p5 = por %p1104_p4, %p1103_p3 }
  0xc5   :  { %p1106_p6 = pnand %p1105_p5, %p1099_p2 }
  0xc7   :  { %1109 = shalt.err (!%p1106_p6)  }
  0xc8   :  { %193 = dma.hbm_to_vmem [thread:$0]  %s180_s2, 16, %s191_s13, [#allocation2 + $0x7] }
  0xc9   :  { %s833_s16 = sshll.u32 %s1994_s14, 4  ;;  %s1786_s3 = smov [#allocation5 + $0x9]  }
  0xca   :  { %s220_s11 = sshll.u32 %s1786_s3, 4  ;;  %s195_s9 = scalar_lea.hbm %s2317_s1, %s833_s16  ;;  %s2014_s11 = int_to_ptr.vmem [resolvable:$true] %s220_s11 }
  0xcb   :  { %s1110_s5 = scalar_lea.hbm %s195_s9, 16  ;;  %p1113_p8 = scmp.lt.u32.totalorder %s195_s9, %s2317_s1 }
  0xcc   :  { %p1111_p7 = scmp.ne.s32.totalorder %s195_s9, %s1110_s5  ;;  %p1114_p9 = scmp.lt.u32.totalorder %s1880_s17, %s1110_s5 }
  0xcd   :  { %p1116_p12 = scmp.lt.u32.totalorder %s1110_s5, %s195_s9 }
  0xce   :  { %p1115_p10 = por %p1114_p9, %p1113_p8 }
  0xd0   :  { %p1117_p13 = por %p1116_p12, %p1115_p10 }
  0xd2   :  { %p1118_p0 = pnand %p1117_p13, %p1111_p7 }
  0xd4   :  { %1121 = shalt.err (!%p1118_p0)  }
  0xd5   :  { %s1122_s13 = scalar_lea.vmem %s1999_s18, 16  ;;  %p1127_p2 = scmp.lt.s32.totalorder %s1999_s18, %s1875_s12 }
  0xd6   :  { %p1123_p1 = scmp.ne.s32.totalorder %s1999_s18, %s1122_s13  ;;  %p1128_p3 = scmp.lt.s32.totalorder %s1889_s7, %s1122_s13 }
  0xd8   :  { %p1129_p4 = por %p1128_p3, %p1127_p2 }
  0xda   :  { %p1130_p5 = pnand %p1129_p4, %p1123_p1 }
  0xdc   :  { %1133 = shalt.err (!%p1130_p5)  }
  0xdd   :  { %208 = dma.hbm_to_vmem [thread:$0]  %s195_s9, 16, %s1999_s18, [#allocation2 + $0x8] }
  0xde   :  { %s834_s14 = sshll.u32 %s1996_s19, 4  ;;  %s2027_s2 = sld [smem:[#allocation4 + $0xa]] }
  0xdf   :  { %s210_s3 = scalar_lea.hbm %s2317_s1, %s834_s14 }
  0xe0   :  { %s1134_s4 = scalar_lea.hbm %s210_s3, 16  ;;  %p1137_p7 = scmp.lt.u32.totalorder %s210_s3, %s2317_s1 }
  0xe1   :  { %p1135_p6 = scmp.ne.s32.totalorder %s210_s3, %s1134_s4  ;;  %p1138_p8 = scmp.lt.u32.totalorder %s1880_s17, %s1134_s4 }
  0xe2   :  { %p1140_p10 = scmp.lt.u32.totalorder %s1134_s4, %s210_s3 }
  0xe3   :  { %p1139_p9 = por %p1138_p8, %p1137_p7 }
  0xe5   :  { %p1141_p12 = por %p1140_p10, %p1139_p9 }
  0xe7   :  { %p1142_p13 = pnand %p1141_p12, %p1135_p6 }
  0xe9   :  { %1145 = shalt.err (!%p1142_p13)  }
  0xea   :  { %s1146_s18 = scalar_lea.vmem %s2014_s11, 16  ;;  %p1151_p1 = scmp.lt.s32.totalorder %s2014_s11, %s1875_s12 }
  0xeb   :  { %p1147_p0 = scmp.ne.s32.totalorder %s2014_s11, %s1146_s18  ;;  %p1152_p2 = scmp.lt.s32.totalorder %s1889_s7, %s1146_s18 }
  0xed   :  { %p1153_p3 = por %p1152_p2, %p1151_p1 }
  0xef   :  { %p1154_p4 = pnand %p1153_p3, %p1147_p0 }
  0xf1   :  { %1157 = shalt.err (!%p1154_p4)  }
  0xf2   :  { %223 = dma.hbm_to_vmem [thread:$0]  %s210_s3, 16, %s2014_s11, [#allocation2 + $0x9] }
  0xf3   :  { %s1787_s19 = smov [#allocation5 + $0xa]   ;;  %s2042_s6 = sld [smem:[#allocation4 + $0xb]] }
  0xf4   :  { %s235_s9 = sshll.u32 %s1787_s19, 4  ;;  %s1788_s10 = smov [#allocation5 + $0xb]   ;;  %s236_s9 = int_to_ptr.vmem [resolvable:$true] %s235_s9 }
  0xf5   :  { %s250_s13 = sshll.u32 %s1788_s10, 4  ;;  %s2044_s14 = sld [smem:[#allocation4 + $0xc]]  ;;  %s2047_s13 = int_to_ptr.vmem [resolvable:$true] %s250_s13 }
  0xf6   :  { %s835_s15 = sshll.u32 %s2027_s2, 4 }
  0xf7   :  { %s225_s8 = scalar_lea.hbm %s2317_s1, %s835_s15 }
  0xf8   :  { %s1158_s5 = scalar_lea.hbm %s225_s8, 16  ;;  %p1161_p6 = scmp.lt.u32.totalorder %s225_s8, %s2317_s1 }
  0xf9   :  { %p1159_p5 = scmp.ne.s32.totalorder %s225_s8, %s1158_s5  ;;  %p1162_p7 = scmp.lt.u32.totalorder %s1880_s17, %s1158_s5 }
  0xfa   :  { %p1164_p9 = scmp.lt.u32.totalorder %s1158_s5, %s225_s8 }
  0xfb   :  { %p1163_p8 = por %p1162_p7, %p1161_p6 }
  0xfd   :  { %p1165_p10 = por %p1164_p9, %p1163_p8 }
  0xff   :  { %p1166_p12 = pnand %p1165_p10, %p1159_p5 }
 0x101   :  { %1169 = shalt.err (!%p1166_p12)  }
 0x102   :  { %s1170_s3 = scalar_lea.vmem %s236_s9, 16  ;;  %p1175_p0 = scmp.lt.s32.totalorder %s236_s9, %s1875_s12 }
 0x103   :  { %p1171_p13 = scmp.ne.s32.totalorder %s236_s9, %s1170_s3  ;;  %p1176_p1 = scmp.lt.s32.totalorder %s1889_s7, %s1170_s3 }
 0x105   :  { %p1177_p2 = por %p1176_p1, %p1175_p0 }
 0x107   :  { %p1178_p3 = pnand %p1177_p2, %p1171_p13 }
 0x109   :  { %1181 = shalt.err (!%p1178_p3)  }
 0x10a   :  { %238 = dma.hbm_to_vmem [thread:$0]  %s225_s8, 16, %s236_s9, [#allocation2 + $0xa] }
 0x10b   :  { %s836_s2 = sshll.u32 %s2042_s6, 4  ;;  %s1789_s19 = smov [#allocation5 + $0xc]  }
 0x10c   :  { %s265_s10 = sshll.u32 %s1789_s19, 4  ;;  %s240_s4 = scalar_lea.hbm %s2317_s1, %s836_s2  ;;  %s2062_s10 = int_to_ptr.vmem [resolvable:$true] %s265_s10 }
 0x10d   :  { %s1182_s5 = scalar_lea.hbm %s240_s4, 16  ;;  %p1185_p5 = scmp.lt.u32.totalorder %s240_s4, %s2317_s1 }
 0x10e   :  { %p1183_p4 = scmp.ne.s32.totalorder %s240_s4, %s1182_s5  ;;  %p1186_p6 = scmp.lt.u32.totalorder %s1880_s17, %s1182_s5 }
 0x10f   :  { %p1188_p8 = scmp.lt.u32.totalorder %s1182_s5, %s240_s4 }
 0x110   :  { %p1187_p7 = por %p1186_p6, %p1185_p5 }
 0x112   :  { %p1189_p9 = por %p1188_p8, %p1187_p7 }
 0x114   :  { %p1190_p10 = pnand %p1189_p9, %p1183_p4 }
 0x116   :  { %1193 = shalt.err (!%p1190_p10)  }
 0x117   :  { %s1194_s9 = scalar_lea.vmem %s2047_s13, 16  ;;  %p1199_p13 = scmp.lt.s32.totalorder %s2047_s13, %s1875_s12 }
 0x118   :  { %p1195_p12 = scmp.ne.s32.totalorder %s2047_s13, %s1194_s9  ;;  %p1200_p0 = scmp.lt.s32.totalorder %s1889_s7, %s1194_s9 }
 0x11a   :  { %p1201_p1 = por %p1200_p0, %p1199_p13 }
 0x11c   :  { %p1202_p2 = pnand %p1201_p1, %p1195_p12 }
 0x11e   :  { %1205 = shalt.err (!%p1202_p2)  }
 0x11f   :  { %253 = dma.hbm_to_vmem [thread:$0]  %s240_s4, 16, %s2047_s13, [#allocation2 + $0xb] }
 0x120   :  { %s837_s6 = sshll.u32 %s2044_s14, 4  ;;  %s2075_s8 = sld [smem:[#allocation4 + $0xd]] }
 0x121   :  { %s255_s19 = scalar_lea.hbm %s2317_s1, %s837_s6 }
 0x122   :  { %s1206_s15 = scalar_lea.hbm %s255_s19, 16  ;;  %p1209_p4 = scmp.lt.u32.totalorder %s255_s19, %s2317_s1 }
 0x123   :  { %p1207_p3 = scmp.ne.s32.totalorder %s255_s19, %s1206_s15  ;;  %p1210_p5 = scmp.lt.u32.totalorder %s1880_s17, %s1206_s15 }
 0x124   :  { %p1212_p7 = scmp.lt.u32.totalorder %s1206_s15, %s255_s19 }
 0x125   :  { %p1211_p6 = por %p1210_p5, %p1209_p4 }
 0x127   :  { %p1213_p8 = por %p1212_p7, %p1211_p6 }
 0x129   :  { %p1214_p9 = pnand %p1213_p8, %p1207_p3 }
 0x12b   :  { %1217 = shalt.err (!%p1214_p9)  }
 0x12c   :  { %s1218_s13 = scalar_lea.vmem %s2062_s10, 16  ;;  %p1223_p12 = scmp.lt.s32.totalorder %s2062_s10, %s1875_s12 }
 0x12d   :  { %p1219_p10 = scmp.ne.s32.totalorder %s2062_s10, %s1218_s13  ;;  %p1224_p13 = scmp.lt.s32.totalorder %s1889_s7, %s1218_s13 }
 0x12f   :  { %p1225_p0 = por %p1224_p13, %p1223_p12 }
 0x131   :  { %p1226_p1 = pnand %p1225_p0, %p1219_p10 }
 0x133   :  { %1229 = shalt.err (!%p1226_p1)  }
 0x134   :  { %268 = dma.hbm_to_vmem [thread:$0]  %s255_s19, 16, %s2062_s10, [#allocation2 + $0xc] }
 0x135   :  { %s1790_s14 = smov [#allocation5 + $0xd]   ;;  %s2090_s18 = sld [smem:[#allocation4 + $0xe]] }
 0x136   :  { %s280_s4 = sshll.u32 %s1790_s14, 4  ;;  %s1791_s11 = smov [#allocation5 + $0xe]   ;;  %s281_s4 = int_to_ptr.vmem [resolvable:$true] %s280_s4 }
 0x137   :  { %s295_s9 = sshll.u32 %s1791_s11, 4  ;;  %s2092_s6 = sld [smem:[#allocation4 + $0xf]]  ;;  %s2095_s9 = int_to_ptr.vmem [resolvable:$true] %s295_s9 }
 0x138   :  { %s838_s3 = sshll.u32 %s2075_s8, 4 }
 0x139   :  { %s270_s16 = scalar_lea.hbm %s2317_s1, %s838_s3 }
 0x13a   :  { %s1230_s5 = scalar_lea.hbm %s270_s16, 16  ;;  %p1233_p3 = scmp.lt.u32.totalorder %s270_s16, %s2317_s1 }
 0x13b   :  { %p1231_p2 = scmp.ne.s32.totalorder %s270_s16, %s1230_s5  ;;  %p1234_p4 = scmp.lt.u32.totalorder %s1880_s17, %s1230_s5 }
 0x13c   :  { %p1236_p6 = scmp.lt.u32.totalorder %s1230_s5, %s270_s16 }
 0x13d   :  { %p1235_p5 = por %p1234_p4, %p1233_p3 }
 0x13f   :  { %p1237_p7 = por %p1236_p6, %p1235_p5 }
 0x141   :  { %p1238_p8 = pnand %p1237_p7, %p1231_p2 }
 0x143   :  { %1241 = shalt.err (!%p1238_p8)  }
 0x144   :  { %s1242_s19 = scalar_lea.vmem %s281_s4, 16  ;;  %p1247_p10 = scmp.lt.s32.totalorder %s281_s4, %s1875_s12 }
 0x145   :  { %p1243_p9 = scmp.ne.s32.totalorder %s281_s4, %s1242_s19  ;;  %p1248_p12 = scmp.lt.s32.totalorder %s1889_s7, %s1242_s19 }
 0x147   :  { %p1249_p13 = por %p1248_p12, %p1247_p10 }
 0x149   :  { %p1250_p0 = pnand %p1249_p13, %p1243_p9 }
 0x14b   :  { %1253 = shalt.err (!%p1250_p0)  }
 0x14c   :  { %283 = dma.hbm_to_vmem [thread:$0]  %s270_s16, 16, %s281_s4, [#allocation2 + $0xd] }
 0x14d   :  { %s839_s8 = sshll.u32 %s2090_s18, 4  ;;  %s1792_s14 = smov [#allocation5 + $0xf]  }
 0x14e   :  { %s310_s11 = sshll.u32 %s1792_s14, 4  ;;  %s285_s15 = scalar_lea.hbm %s2317_s1, %s839_s8  ;;  %s2110_s11 = int_to_ptr.vmem [resolvable:$true] %s310_s11 }
 0x14f   :  { %s1254_s5 = scalar_lea.hbm %s285_s15, 16  ;;  %p1257_p2 = scmp.lt.u32.totalorder %s285_s15, %s2317_s1 }
 0x150   :  { %p1255_p1 = scmp.ne.s32.totalorder %s285_s15, %s1254_s5  ;;  %p1258_p3 = scmp.lt.u32.totalorder %s1880_s17, %s1254_s5 }
 0x151   :  { %p1260_p5 = scmp.lt.u32.totalorder %s1254_s5, %s285_s15 }
 0x152   :  { %p1259_p4 = por %p1258_p3, %p1257_p2 }
 0x154   :  { %p1261_p6 = por %p1260_p5, %p1259_p4 }
 0x156   :  { %p1262_p7 = pnand %p1261_p6, %p1255_p1 }
 0x158   :  { %1265 = shalt.err (!%p1262_p7)  }
 0x159   :  { %s1266_s4 = scalar_lea.vmem %s2095_s9, 16  ;;  %p1271_p9 = scmp.lt.s32.totalorder %s2095_s9, %s1875_s12 }
 0x15a   :  { %p1267_p8 = scmp.ne.s32.totalorder %s2095_s9, %s1266_s4  ;;  %p1272_p10 = scmp.lt.s32.totalorder %s1889_s7, %s1266_s4 }
 0x15c   :  { %p1273_p12 = por %p1272_p10, %p1271_p9 }
 0x15e   :  { %p1274_p13 = pnand %p1273_p12, %p1267_p8 }
 0x160   :  { %1277 = shalt.err (!%p1274_p13)  }
 0x161   :  { %298 = dma.hbm_to_vmem [thread:$0]  %s285_s15, 16, %s2095_s9, [#allocation2 + $0xe] }
 0x162   :  { %s840_s18 = sshll.u32 %s2092_s6, 4 }
 0x163   :  { %s300_s8 = scalar_lea.hbm %s2317_s1, %s840_s18 }
 0x164   :  { %s1278_s14 = scalar_lea.hbm %s300_s8, 16  ;;  %p1281_p1 = scmp.lt.u32.totalorder %s300_s8, %s2317_s1 }
 0x165   :  { %p1279_p0 = scmp.ne.s32.totalorder %s300_s8, %s1278_s14  ;;  %p1282_p2 = scmp.lt.u32.totalorder %s1880_s17, %s1278_s14 }
 0x166   :  { %p1284_p4 = scmp.lt.u32.totalorder %s1278_s14, %s300_s8 }
 0x167   :  { %p1283_p3 = por %p1282_p2, %p1281_p1 }
 0x169   :  { %p1285_p5 = por %p1284_p4, %p1283_p3 }
 0x16b   :  { %p1286_p6 = pnand %p1285_p5, %p1279_p0 }
 0x16d   :  { %1289 = shalt.err (!%p1286_p6)  }
 0x16e   :  { %s1290_s9 = scalar_lea.vmem %s2110_s11, 16  ;;  %p1295_p8 = scmp.lt.s32.totalorder %s2110_s11, %s1875_s12 }
 0x16f   :  { %p1291_p7 = scmp.ne.s32.totalorder %s2110_s11, %s1290_s9  ;;  %p1296_p9 = scmp.lt.s32.totalorder %s1889_s7, %s1290_s9 }
 0x171   :  { %p1297_p10 = por %p1296_p9, %p1295_p8 }
 0x173   :  { %p1298_p12 = pnand %p1297_p10, %p1291_p7 }
 0x175   :  { %1301 = shalt.err (!%p1298_p12)  }
 0x176   :  { %313 = dma.hbm_to_vmem [thread:$0]  %s300_s8, 16, %s2110_s11, [#allocation2 + $0xf] }
 0x177   :  { %1710 = dma.done.wait [#allocation2], 16 }
 0x178   :  { %1711 = vsyncadd [#allocation2], 4294967280  ;;  %s841_s6 = sshll.u32 %s1838_s20, 4  ;;  %s1793_s10 = smov [#allocation5 + $0x10]  }
 0x179   :  { %s318_s13 = scalar_lea.hbm %s2317_s1, %s841_s6  ;;  %s327_s4 = sshll.u32 %s1793_s10, 4  ;;  %s328_s4 = int_to_ptr.vmem [resolvable:$true] %s327_s4 }
 0x17a   :  { %s1302_s18 = scalar_lea.hbm %s318_s13, 16  ;;  %p1305_p0 = scmp.lt.u32.totalorder %s318_s13, %s2317_s1 }
 0x17b   :  { %p1303_p13 = scmp.ne.s32.totalorder %s318_s13, %s1302_s18  ;;  %p1306_p1 = scmp.lt.u32.totalorder %s1880_s17, %s1302_s18 }
 0x17c   :  { %p1308_p3 = scmp.lt.u32.totalorder %s1302_s18, %s318_s13 }
 0x17d   :  { %p1307_p2 = por %p1306_p1, %p1305_p0 }
 0x17f   :  { %p1309_p4 = por %p1308_p3, %p1307_p2 }
 0x181   :  { %p1310_p5 = pnand %p1309_p4, %p1303_p13 }
 0x183   :  { %1313 = shalt.err (!%p1310_p5)  }
 0x184   :  { %s1314_s20 = scalar_lea.vmem %s328_s4, 16  ;;  %p1319_p7 = scmp.lt.s32.totalorder %s328_s4, %s1875_s12 }
 0x185   :  { %p1315_p6 = scmp.ne.s32.totalorder %s328_s4, %s1314_s20  ;;  %p1320_p8 = scmp.lt.s32.totalorder %s1889_s7, %s1314_s20 }
 0x187   :  { %p1321_p9 = por %p1320_p8, %p1319_p7 }
 0x189   :  { %p1322_p10 = pnand %p1321_p9, %p1315_p6 }
 0x18b   :  { %1325 = shalt.err (!%p1322_p10)  }
 0x18c   :  { %330 = dma.hbm_to_vmem [thread:$0]  %s318_s13, 16, %s328_s4, [#allocation2] }
 0x18d   :  { %1712 = dma.done.wait [#allocation2 + $0x1], 16 }
 0x18e   :  { %1713 = vsyncadd [#allocation2 + $0x1], 4294967280  ;;  %s842_s11 = sshll.u32 %s1840_s21, 4  ;;  %s1794_s2 = smov [#allocation5 + $0x11]  }
 0x18f   :  { %s334_s3 = scalar_lea.hbm %s2317_s1, %s842_s11  ;;  %s343_s9 = sshll.u32 %s1794_s2, 4  ;;  %s344_s9 = int_to_ptr.vmem [resolvable:$true] %s343_s9 }
 0x190   :  { %s1326_s6 = scalar_lea.hbm %s334_s3, 16  ;;  %p1329_p13 = scmp.lt.u32.totalorder %s334_s3, %s2317_s1 }
 0x191   :  { %p1327_p12 = scmp.ne.s32.totalorder %s334_s3, %s1326_s6  ;;  %p1330_p0 = scmp.lt.u32.totalorder %s1880_s17, %s1326_s6 }
 0x192   :  { %p1332_p2 = scmp.lt.u32.totalorder %s1326_s6, %s334_s3 }
 0x193   :  { %p1331_p1 = por %p1330_p0, %p1329_p13 }
 0x195   :  { %p1333_p3 = por %p1332_p2, %p1331_p1 }
 0x197   :  { %p1334_p4 = pnand %p1333_p3, %p1327_p12 }
 0x199   :  { %1337 = shalt.err (!%p1334_p4)  }
 0x19a   :  { %s1338_s21 = scalar_lea.vmem %s344_s9, 16  ;;  %p1343_p6 = scmp.lt.s32.totalorder %s344_s9, %s1875_s12 }
 0x19b   :  { %p1339_p5 = scmp.ne.s32.totalorder %s344_s9, %s1338_s21  ;;  %p1344_p7 = scmp.lt.s32.totalorder %s1889_s7, %s1338_s21 }
 0x19d   :  { %p1345_p8 = por %p1344_p7, %p1343_p6 }
 0x19f   :  { %p1346_p9 = pnand %p1345_p8, %p1339_p5 }
 0x1a1   :  { %1349 = shalt.err (!%p1346_p9)  }
 0x1a2   :  { %346 = dma.hbm_to_vmem [thread:$0]  %s334_s3, 16, %s344_s9, [#allocation2 + $0x1] }
 0x1a3   :  { %1714 = dma.done.wait [#allocation2 + $0x2], 16 }
 0x1a4   :  { %1715 = vsyncadd [#allocation2 + $0x2], 4294967280  ;;  %s843_s13 = sshll.u32 %s1842_s22, 4  ;;  %s1795_s16 = smov [#allocation5 + $0x12]  }
 0x1a5   :  { %s350_s18 = scalar_lea.hbm %s2317_s1, %s843_s13  ;;  %s359_s19 = sshll.u32 %s1795_s16, 4  ;;  %s360_s19 = int_to_ptr.vmem [resolvable:$true] %s359_s19 }
 0x1a6   :  { %s1350_s20 = scalar_lea.hbm %s350_s18, 16  ;;  %p1353_p12 = scmp.lt.u32.totalorder %s350_s18, %s2317_s1 }
 0x1a7   :  { %p1351_p10 = scmp.ne.s32.totalorder %s350_s18, %s1350_s20  ;;  %p1354_p13 = scmp.lt.u32.totalorder %s1880_s17, %s1350_s20 }
 0x1a8   :  { %p1356_p1 = scmp.lt.u32.totalorder %s1350_s20, %s350_s18 }
 0x1a9   :  { %p1355_p0 = por %p1354_p13, %p1353_p12 }
 0x1ab   :  { %p1357_p2 = por %p1356_p1, %p1355_p0 }
 0x1ad   :  { %p1358_p3 = pnand %p1357_p2, %p1351_p10 }
 0x1af   :  { %1361 = shalt.err (!%p1358_p3)  }
 0x1b0   :  { %s1362_s22 = scalar_lea.vmem %s360_s19, 16  ;;  %p1367_p5 = scmp.lt.s32.totalorder %s360_s19, %s1875_s12 }
 0x1b1   :  { %p1363_p4 = scmp.ne.s32.totalorder %s360_s19, %s1362_s22  ;;  %p1368_p6 = scmp.lt.s32.totalorder %s1889_s7, %s1362_s22 }
 0x1b3   :  { %p1369_p7 = por %p1368_p6, %p1367_p5 }
 0x1b5   :  { %p1370_p8 = pnand %p1369_p7, %p1363_p4 }
 0x1b7   :  { %1373 = shalt.err (!%p1370_p8)  }
 0x1b8   :  { %362 = dma.hbm_to_vmem [thread:$0]  %s350_s18, 16, %s360_s19, [#allocation2 + $0x2] }
 0x1b9   :  { %1716 = dma.done.wait [#allocation2 + $0x3], 16 }
 0x1ba   :  { %1717 = vsyncadd [#allocation2 + $0x3], 4294967280  ;;  %s844_s14 = sshll.u32 %s1844_s23, 4  ;;  %s1796_s6 = smov [#allocation5 + $0x13]  }
 0x1bb   :  { %s366_s9 = scalar_lea.hbm %s2317_s1, %s844_s14  ;;  %s375_s15 = sshll.u32 %s1796_s6, 4  ;;  %s376_s15 = int_to_ptr.vmem [resolvable:$true] %s375_s15 }
 0x1bc   :  { %s1374_s5 = scalar_lea.hbm %s366_s9, 16  ;;  %p1377_p10 = scmp.lt.u32.totalorder %s366_s9, %s2317_s1 }
 0x1bd   :  { %p1375_p9 = scmp.ne.s32.totalorder %s366_s9, %s1374_s5  ;;  %p1378_p12 = scmp.lt.u32.totalorder %s1880_s17, %s1374_s5 }
 0x1be   :  { %p1380_p0 = scmp.lt.u32.totalorder %s1374_s5, %s366_s9 }
 0x1bf   :  { %p1379_p13 = por %p1378_p12, %p1377_p10 }
 0x1c1   :  { %p1381_p1 = por %p1380_p0, %p1379_p13 }
 0x1c3   :  { %p1382_p2 = pnand %p1381_p1, %p1375_p9 }
 0x1c5   :  { %1385 = shalt.err (!%p1382_p2)  }
 0x1c6   :  { %s1386_s23 = scalar_lea.vmem %s376_s15, 16  ;;  %p1391_p4 = scmp.lt.s32.totalorder %s376_s15, %s1875_s12 }
 0x1c7   :  { %p1387_p3 = scmp.ne.s32.totalorder %s376_s15, %s1386_s23  ;;  %p1392_p5 = scmp.lt.s32.totalorder %s1889_s7, %s1386_s23 }
 0x1c9   :  { %p1393_p6 = por %p1392_p5, %p1391_p4 }
 0x1cb   :  { %p1394_p7 = pnand %p1393_p6, %p1387_p3 }
 0x1cd   :  { %1397 = shalt.err (!%p1394_p7)  }
 0x1ce   :  { %378 = dma.hbm_to_vmem [thread:$0]  %s366_s9, 16, %s376_s15, [#allocation2 + $0x3] }
 0x1cf   :  { %1718 = dma.done.wait [#allocation2 + $0x4], 16 }
 0x1d0   :  { %1719 = vsyncadd [#allocation2 + $0x4], 4294967280  ;;  %s845_s10 = sshll.u32 %s1846_s24, 4  ;;  %s1797_s19 = smov [#allocation5 + $0x14]  }
 0x1d1   :  { %s382_s16 = scalar_lea.hbm %s2317_s1, %s845_s10  ;;  %s391_s20 = sshll.u32 %s1797_s19, 4  ;;  %s392_s20 = int_to_ptr.vmem [resolvable:$true] %s391_s20 }
 0x1d2   :  { %s1398_s11 = scalar_lea.hbm %s382_s16, 16  ;;  %p1401_p9 = scmp.lt.u32.totalorder %s382_s16, %s2317_s1 }
 0x1d3   :  { %p1399_p8 = scmp.ne.s32.totalorder %s382_s16, %s1398_s11  ;;  %p1402_p10 = scmp.lt.u32.totalorder %s1880_s17, %s1398_s11 }
 0x1d4   :  { %p1404_p13 = scmp.lt.u32.totalorder %s1398_s11, %s382_s16 }
 0x1d5   :  { %p1403_p12 = por %p1402_p10, %p1401_p9 }
 0x1d7   :  { %p1405_p0 = por %p1404_p13, %p1403_p12 }
 0x1d9   :  { %p1406_p1 = pnand %p1405_p0, %p1399_p8 }
 0x1db   :  { %1409 = shalt.err (!%p1406_p1)  }
 0x1dc   :  { %s1410_s24 = scalar_lea.vmem %s392_s20, 16  ;;  %p1415_p3 = scmp.lt.s32.totalorder %s392_s20, %s1875_s12 }
 0x1dd   :  { %p1411_p2 = scmp.ne.s32.totalorder %s392_s20, %s1410_s24  ;;  %p1416_p4 = scmp.lt.s32.totalorder %s1889_s7, %s1410_s24 }
 0x1df   :  { %p1417_p5 = por %p1416_p4, %p1415_p3 }
 0x1e1   :  { %p1418_p6 = pnand %p1417_p5, %p1411_p2 }
 0x1e3   :  { %1421 = shalt.err (!%p1418_p6)  }
 0x1e4   :  { %394 = dma.hbm_to_vmem [thread:$0]  %s382_s16, 16, %s392_s20, [#allocation2 + $0x4] }
 0x1e5   :  { %1720 = dma.done.wait [#allocation2 + $0x5], 16 }
 0x1e6   :  { %1721 = vsyncadd [#allocation2 + $0x5], 4294967280  ;;  %s846_s14 = sshll.u32 %s1848_s25, 4  ;;  %s1798_s6 = smov [#allocation5 + $0x15]  }
 0x1e7   :  { %s398_s9 = scalar_lea.hbm %s2317_s1, %s846_s14  ;;  %s407_s15 = sshll.u32 %s1798_s6, 4  ;;  %s408_s15 = int_to_ptr.vmem [resolvable:$true] %s407_s15 }
 0x1e8   :  { %s1422_s5 = scalar_lea.hbm %s398_s9, 16  ;;  %p1425_p8 = scmp.lt.u32.totalorder %s398_s9, %s2317_s1 }
 0x1e9   :  { %p1423_p7 = scmp.ne.s32.totalorder %s398_s9, %s1422_s5  ;;  %p1426_p9 = scmp.lt.u32.totalorder %s1880_s17, %s1422_s5 }
 0x1ea   :  { %p1428_p12 = scmp.lt.u32.totalorder %s1422_s5, %s398_s9 }
 0x1eb   :  { %p1427_p10 = por %p1426_p9, %p1425_p8 }
 0x1ed   :  { %p1429_p13 = por %p1428_p12, %p1427_p10 }
 0x1ef   :  { %p1430_p0 = pnand %p1429_p13, %p1423_p7 }
 0x1f1   :  { %1433 = shalt.err (!%p1430_p0)  }
 0x1f2   :  { %s1434_s25 = scalar_lea.vmem %s408_s15, 16  ;;  %p1439_p2 = scmp.lt.s32.totalorder %s408_s15, %s1875_s12 }
 0x1f3   :  { %p1435_p1 = scmp.ne.s32.totalorder %s408_s15, %s1434_s25  ;;  %p1440_p3 = scmp.lt.s32.totalorder %s1889_s7, %s1434_s25 }
 0x1f5   :  { %p1441_p4 = por %p1440_p3, %p1439_p2 }
 0x1f7   :  { %p1442_p5 = pnand %p1441_p4, %p1435_p1 }
 0x1f9   :  { %1445 = shalt.err (!%p1442_p5)  }
 0x1fa   :  { %410 = dma.hbm_to_vmem [thread:$0]  %s398_s9, 16, %s408_s15, [#allocation2 + $0x5] }
 0x1fb   :  { %1722 = dma.done.wait [#allocation2 + $0x6], 16 }
 0x1fc   :  { %1723 = vsyncadd [#allocation2 + $0x6], 4294967280  ;;  %s847_s23 = sshll.u32 %s1850_s26, 4  ;;  %s1799_s16 = smov [#allocation5 + $0x16]  }
 0x1fd   :  { %s414_s18 = scalar_lea.hbm %s2317_s1, %s847_s23  ;;  %s423_s19 = sshll.u32 %s1799_s16, 4  ;;  %s424_s19 = int_to_ptr.vmem [resolvable:$true] %s423_s19 }
 0x1fe   :  { %s1446_s20 = scalar_lea.hbm %s414_s18, 16  ;;  %p1449_p7 = scmp.lt.u32.totalorder %s414_s18, %s2317_s1 }
 0x1ff   :  { %p1447_p6 = scmp.ne.s32.totalorder %s414_s18, %s1446_s20  ;;  %p1450_p8 = scmp.lt.u32.totalorder %s1880_s17, %s1446_s20 }
 0x200   :  { %p1452_p10 = scmp.lt.u32.totalorder %s1446_s20, %s414_s18 }
 0x201   :  { %p1451_p9 = por %p1450_p8, %p1449_p7 }
 0x203   :  { %p1453_p12 = por %p1452_p10, %p1451_p9 }
 0x205   :  { %p1454_p13 = pnand %p1453_p12, %p1447_p6 }
 0x207   :  { %1457 = shalt.err (!%p1454_p13)  }
 0x208   :  { %s1458_s26 = scalar_lea.vmem %s424_s19, 16  ;;  %p1463_p1 = scmp.lt.s32.totalorder %s424_s19, %s1875_s12 }
 0x209   :  { %p1459_p0 = scmp.ne.s32.totalorder %s424_s19, %s1458_s26  ;;  %p1464_p2 = scmp.lt.s32.totalorder %s1889_s7, %s1458_s26 }
 0x20b   :  { %p1465_p3 = por %p1464_p2, %p1463_p1 }
 0x20d   :  { %p1466_p4 = pnand %p1465_p3, %p1459_p0 }
 0x20f   :  { %1469 = shalt.err (!%p1466_p4)  }
 0x210   :  { %426 = dma.hbm_to_vmem [thread:$0]  %s414_s18, 16, %s424_s19, [#allocation2 + $0x6] }
 0x211   :  { %1724 = dma.done.wait [#allocation2 + $0x7], 16 }
 0x212   :  { %1725 = vsyncadd [#allocation2 + $0x7], 4294967280  ;;  %s848_s22 = sshll.u32 %s1852_s0, 4  ;;  %s1800_s2 = smov [#allocation5 + $0x17]  }
 0x213   :  { %s430_s3 = scalar_lea.hbm %s2317_s1, %s848_s22  ;;  %s439_s9 = sshll.u32 %s1800_s2, 4  ;;  %s440_s9 = int_to_ptr.vmem [resolvable:$true] %s439_s9 }
 0x214   :  { %s1470_s6 = scalar_lea.hbm %s430_s3, 16  ;;  %p1473_p6 = scmp.lt.u32.totalorder %s430_s3, %s2317_s1 }
 0x215   :  { %p1471_p5 = scmp.ne.s32.totalorder %s430_s3, %s1470_s6  ;;  %p1474_p7 = scmp.lt.u32.totalorder %s1880_s17, %s1470_s6 }
 0x216   :  { %p1476_p9 = scmp.lt.u32.totalorder %s1470_s6, %s430_s3 }
 0x217   :  { %p1475_p8 = por %p1474_p7, %p1473_p6 }
 0x219   :  { %p1477_p10 = por %p1476_p9, %p1475_p8 }
 0x21b   :  { %p1478_p12 = pnand %p1477_p10, %p1471_p5 }
 0x21d   :  { %1481 = shalt.err (!%p1478_p12)  }
 0x21e   :  { %s1482_s0 = scalar_lea.vmem %s440_s9, 16  ;;  %p1487_p0 = scmp.lt.s32.totalorder %s440_s9, %s1875_s12 }
 0x21f   :  { %p1483_p13 = scmp.ne.s32.totalorder %s440_s9, %s1482_s0  ;;  %p1488_p1 = scmp.lt.s32.totalorder %s1889_s7, %s1482_s0 }
 0x221   :  { %p1489_p2 = por %p1488_p1, %p1487_p0 }
 0x223   :  { %p1490_p3 = pnand %p1489_p2, %p1483_p13 }
 0x225   :  { %1493 = shalt.err (!%p1490_p3)  }
 0x226   :  { %442 = dma.hbm_to_vmem [thread:$0]  %s430_s3, 16, %s440_s9, [#allocation2 + $0x7] }
 0x227   :  { %1726 = dma.done.wait [#allocation2 + $0x8], 16 }
 0x228   :  { %1727 = vsyncadd [#allocation2 + $0x8], 4294967280  ;;  %s849_s21 = sshll.u32 %s1854_s27, 4  ;;  %s1801_s10 = smov [#allocation5 + $0x18]  }
 0x229   :  { %s446_s23 = scalar_lea.hbm %s2317_s1, %s849_s21  ;;  %s455_s4 = sshll.u32 %s1801_s10, 4  ;;  %s456_s4 = int_to_ptr.vmem [resolvable:$true] %s455_s4 }
 0x22a   :  { %s1494_s18 = scalar_lea.hbm %s446_s23, 16  ;;  %p1497_p5 = scmp.lt.u32.totalorder %s446_s23, %s2317_s1 }
 0x22b   :  { %p1495_p4 = scmp.ne.s32.totalorder %s446_s23, %s1494_s18  ;;  %p1498_p6 = scmp.lt.u32.totalorder %s1880_s17, %s1494_s18 }
 0x22c   :  { %p1500_p8 = scmp.lt.u32.totalorder %s1494_s18, %s446_s23 }
 0x22d   :  { %p1499_p7 = por %p1498_p6, %p1497_p5 }
 0x22f   :  { %p1501_p9 = por %p1500_p8, %p1499_p7 }
 0x231   :  { %p1502_p10 = pnand %p1501_p9, %p1495_p4 }
 0x233   :  { %1505 = shalt.err (!%p1502_p10)  }
 0x234   :  { %s1506_s27 = scalar_lea.vmem %s456_s4, 16  ;;  %p1511_p13 = scmp.lt.s32.totalorder %s456_s4, %s1875_s12 }
 0x235   :  { %p1507_p12 = scmp.ne.s32.totalorder %s456_s4, %s1506_s27  ;;  %p1512_p0 = scmp.lt.s32.totalorder %s1889_s7, %s1506_s27 }
 0x237   :  { %p1513_p1 = por %p1512_p0, %p1511_p13 }
 0x239   :  { %p1514_p2 = pnand %p1513_p1, %p1507_p12 }
 0x23b   :  { %1517 = shalt.err (!%p1514_p2)  }
 0x23c   :  { %458 = dma.hbm_to_vmem [thread:$0]  %s446_s23, 16, %s456_s4, [#allocation2 + $0x8] }
 0x23d   :  { %1728 = dma.done.wait [#allocation2 + $0x9], 16 }
 0x23e   :  { %1729 = vsyncadd [#allocation2 + $0x9], 4294967280  ;;  %s850_s20 = sshll.u32 %s1856_s28, 4  ;;  %s1802_s22 = smov [#allocation5 + $0x19]  }
 0x23f   :  { %s462_s26 = scalar_lea.hbm %s2317_s1, %s850_s20  ;;  %s471_s24 = sshll.u32 %s1802_s22, 4  ;;  %s472_s24 = int_to_ptr.vmem [resolvable:$true] %s471_s24 }
 0x240   :  { %s1518_s14 = scalar_lea.hbm %s462_s26, 16  ;;  %p1521_p4 = scmp.lt.u32.totalorder %s462_s26, %s2317_s1 }
 0x241   :  { %p1519_p3 = scmp.ne.s32.totalorder %s462_s26, %s1518_s14  ;;  %p1522_p5 = scmp.lt.u32.totalorder %s1880_s17, %s1518_s14 }
 0x242   :  { %p1524_p7 = scmp.lt.u32.totalorder %s1518_s14, %s462_s26 }
 0x243   :  { %p1523_p6 = por %p1522_p5, %p1521_p4 }
 0x245   :  { %p1525_p8 = por %p1524_p7, %p1523_p6 }
 0x247   :  { %p1526_p9 = pnand %p1525_p8, %p1519_p3 }
 0x249   :  { %1529 = shalt.err (!%p1526_p9)  }
 0x24a   :  { %s1530_s28 = scalar_lea.vmem %s472_s24, 16  ;;  %p1535_p12 = scmp.lt.s32.totalorder %s472_s24, %s1875_s12 }
 0x24b   :  { %p1531_p10 = scmp.ne.s32.totalorder %s472_s24, %s1530_s28  ;;  %p1536_p13 = scmp.lt.s32.totalorder %s1889_s7, %s1530_s28 }
 0x24d   :  { %p1537_p0 = por %p1536_p13, %p1535_p12 }
 0x24f   :  { %p1538_p1 = pnand %p1537_p0, %p1531_p10 }
 0x251   :  { %1541 = shalt.err (!%p1538_p1)  }
 0x252   :  { %474 = dma.hbm_to_vmem [thread:$0]  %s462_s26, 16, %s472_s24, [#allocation2 + $0x9] }
 0x253   :  { %1730 = dma.done.wait [#allocation2 + $0xa], 16 }
 0x254   :  { %1731 = vsyncadd [#allocation2 + $0xa], 4294967280  ;;  %s851_s9 = sshll.u32 %s1858_s29, 4  ;;  %s1803_s0 = smov [#allocation5 + $0x1a]  }
 0x255   :  { %s478_s5 = scalar_lea.hbm %s2317_s1, %s851_s9  ;;  %s487_s21 = sshll.u32 %s1803_s0, 4  ;;  %s488_s21 = int_to_ptr.vmem [resolvable:$true] %s487_s21 }
 0x256   :  { %s1542_s13 = scalar_lea.hbm %s478_s5, 16  ;;  %p1545_p3 = scmp.lt.u32.totalorder %s478_s5, %s2317_s1 }
 0x257   :  { %p1543_p2 = scmp.ne.s32.totalorder %s478_s5, %s1542_s13  ;;  %p1546_p4 = scmp.lt.u32.totalorder %s1880_s17, %s1542_s13 }
 0x258   :  { %p1548_p6 = scmp.lt.u32.totalorder %s1542_s13, %s478_s5 }
 0x259   :  { %p1547_p5 = por %p1546_p4, %p1545_p3 }
 0x25b   :  { %p1549_p7 = por %p1548_p6, %p1547_p5 }
 0x25d   :  { %p1550_p8 = pnand %p1549_p7, %p1543_p2 }
 0x25f   :  { %1553 = shalt.err (!%p1550_p8)  }
 0x260   :  { %s1554_s29 = scalar_lea.vmem %s488_s21, 16  ;;  %p1559_p10 = scmp.lt.s32.totalorder %s488_s21, %s1875_s12 }
 0x261   :  { %p1555_p9 = scmp.ne.s32.totalorder %s488_s21, %s1554_s29  ;;  %p1560_p12 = scmp.lt.s32.totalorder %s1889_s7, %s1554_s29 }
 0x263   :  { %p1561_p13 = por %p1560_p12, %p1559_p10 }
 0x265   :  { %p1562_p0 = pnand %p1561_p13, %p1555_p9 }
 0x267   :  { %1565 = shalt.err (!%p1562_p0)  }
 0x268   :  { %490 = dma.hbm_to_vmem [thread:$0]  %s478_s5, 16, %s488_s21, [#allocation2 + $0xa] }
 0x269   :  { %1732 = dma.done.wait [#allocation2 + $0xb], 16 }
 0x26a   :  { %1733 = vsyncadd [#allocation2 + $0xb], 4294967280  ;;  %s852_s10 = sshll.u32 %s1860_s30, 4  ;;  %s1804_s19 = smov [#allocation5 + $0x1b]  }
 0x26b   :  { %s494_s16 = scalar_lea.hbm %s2317_s1, %s852_s10  ;;  %s503_s27 = sshll.u32 %s1804_s19, 4  ;;  %s504_s27 = int_to_ptr.vmem [resolvable:$true] %s503_s27 }
 0x26c   :  { %s1566_s20 = scalar_lea.hbm %s494_s16, 16  ;;  %p1569_p2 = scmp.lt.u32.totalorder %s494_s16, %s2317_s1 }
 0x26d   :  { %p1567_p1 = scmp.ne.s32.totalorder %s494_s16, %s1566_s20  ;;  %p1570_p3 = scmp.lt.u32.totalorder %s1880_s17, %s1566_s20 }
 0x26e   :  { %p1572_p5 = scmp.lt.u32.totalorder %s1566_s20, %s494_s16 }
 0x26f   :  { %p1571_p4 = por %p1570_p3, %p1569_p2 }
 0x271   :  { %p1573_p6 = por %p1572_p5, %p1571_p4 }
 0x273   :  { %p1574_p7 = pnand %p1573_p6, %p1567_p1 }
 0x275   :  { %1577 = shalt.err (!%p1574_p7)  }
 0x276   :  { %s1578_s30 = scalar_lea.vmem %s504_s27, 16  ;;  %p1583_p9 = scmp.lt.s32.totalorder %s504_s27, %s1875_s12 }
 0x277   :  { %p1579_p8 = scmp.ne.s32.totalorder %s504_s27, %s1578_s30  ;;  %p1584_p10 = scmp.lt.s32.totalorder %s1889_s7, %s1578_s30 }
 0x279   :  { %p1585_p12 = por %p1584_p10, %p1583_p9 }
 0x27b   :  { %p1586_p13 = pnand %p1585_p12, %p1579_p8 }
 0x27d   :  { %1589 = shalt.err (!%p1586_p13)  }
 0x27e   :  { %506 = dma.hbm_to_vmem [thread:$0]  %s494_s16, 16, %s504_s27, [#allocation2 + $0xb] }
 0x27f   :  { %1734 = dma.done.wait [#allocation2 + $0xc], 16 }
 0x280   :  { %1735 = vsyncadd [#allocation2 + $0xc], 4294967280  ;;  %s2325_s26 = sld [smem:[#allocation107_spill]]  ;;  %s1805_s2 = smov [#allocation5 + $0x1c]  }
 0x281   :  { %s519_s28 = sshll.u32 %s1805_s2, 4  ;;  %s520_s28 = int_to_ptr.vmem [resolvable:$true] %s519_s28 }
 0x286   :  { %s853_s22 = sshll.u32 %s2325_s26, 4 }
 0x287   :  { %s510_s3 = scalar_lea.hbm %s2317_s1, %s853_s22 }
 0x288   :  { %s1590_s9 = scalar_lea.hbm %s510_s3, 16  ;;  %p1593_p1 = scmp.lt.u32.totalorder %s510_s3, %s2317_s1 }
 0x289   :  { %p1591_p0 = scmp.ne.s32.totalorder %s510_s3, %s1590_s9  ;;  %p1594_p2 = scmp.lt.u32.totalorder %s1880_s17, %s1590_s9 }
 0x28a   :  { %p1596_p4 = scmp.lt.u32.totalorder %s1590_s9, %s510_s3 }
 0x28b   :  { %p1595_p3 = por %p1594_p2, %p1593_p1 }
 0x28d   :  { %p1597_p5 = por %p1596_p4, %p1595_p3 }
 0x28f   :  { %p1598_p6 = pnand %p1597_p5, %p1591_p0 }
 0x291   :  { %1601 = shalt.err (!%p1598_p6)  }
 0x292   :  { %s1602_s5 = scalar_lea.vmem %s520_s28, 16  ;;  %p1607_p8 = scmp.lt.s32.totalorder %s520_s28, %s1875_s12 }
 0x293   :  { %p1603_p7 = scmp.ne.s32.totalorder %s520_s28, %s1602_s5  ;;  %p1608_p9 = scmp.lt.s32.totalorder %s1889_s7, %s1602_s5 }
 0x295   :  { %p1609_p10 = por %p1608_p9, %p1607_p8 }
 0x297   :  { %p1610_p12 = pnand %p1609_p10, %p1603_p7 }
 0x299   :  { %1613 = shalt.err (!%p1610_p12)  }
 0x29a   :  { %522 = dma.hbm_to_vmem [thread:$0]  %s510_s3, 16, %s520_s28, [#allocation2 + $0xc] }
 0x29b   :  { %1736 = dma.done.wait [#allocation2 + $0xd], 16 }
 0x29c   :  { %1737 = vsyncadd [#allocation2 + $0xd], 4294967280  ;;  %s2326_s0 = sld [smem:[#allocation108_spill]]  ;;  %s1806_s29 = smov [#allocation5 + $0x1d]  }
 0x29d   :  { %s535_s10 = sshll.u32 %s1806_s29, 4  ;;  %s536_s10 = int_to_ptr.vmem [resolvable:$true] %s535_s10 }
 0x2a2   :  { %s854_s21 = sshll.u32 %s2326_s0, 4 }
 0x2a3   :  { %s526_s23 = scalar_lea.hbm %s2317_s1, %s854_s21 }
 0x2a4   :  { %s1614_s4 = scalar_lea.hbm %s526_s23, 16  ;;  %p1617_p0 = scmp.lt.u32.totalorder %s526_s23, %s2317_s1 }
 0x2a5   :  { %p1615_p13 = scmp.ne.s32.totalorder %s526_s23, %s1614_s4  ;;  %p1618_p1 = scmp.lt.u32.totalorder %s1880_s17, %s1614_s4 }
 0x2a6   :  { %p1620_p3 = scmp.lt.u32.totalorder %s1614_s4, %s526_s23 }
 0x2a7   :  { %p1619_p2 = por %p1618_p1, %p1617_p0 }
 0x2a9   :  { %p1621_p4 = por %p1620_p3, %p1619_p2 }
 0x2ab   :  { %p1622_p5 = pnand %p1621_p4, %p1615_p13 }
 0x2ad   :  { %1625 = shalt.err (!%p1622_p5)  }
 0x2ae   :  { %s1626_s19 = scalar_lea.vmem %s536_s10, 16  ;;  %p1631_p7 = scmp.lt.s32.totalorder %s536_s10, %s1875_s12 }
 0x2af   :  { %p1627_p6 = scmp.ne.s32.totalorder %s536_s10, %s1626_s19  ;;  %p1632_p8 = scmp.lt.s32.totalorder %s1889_s7, %s1626_s19 }
 0x2b1   :  { %p1633_p9 = por %p1632_p8, %p1631_p7 }
 0x2b3   :  { %p1634_p10 = pnand %p1633_p9, %p1627_p6 }
 0x2b5   :  { %1637 = shalt.err (!%p1634_p10)  }
 0x2b6   :  { %538 = dma.hbm_to_vmem [thread:$0]  %s526_s23, 16, %s536_s10, [#allocation2 + $0xd] }
 0x2b7   :  { %1738 = dma.done.wait [#allocation2 + $0xe], 16 }
 0x2b8   :  { %1739 = vsyncadd [#allocation2 + $0xe], 4294967280  ;;  %s2327_s27 = sld [smem:[#allocation109_spill]]  ;;  %s1807_s26 = smov [#allocation5 + $0x1e]  }
 0x2b9   :  { %s551_s22 = sshll.u32 %s1807_s26, 4  ;;  %s552_s22 = int_to_ptr.vmem [resolvable:$true] %s551_s22 }
 0x2be   :  { %s855_s20 = sshll.u32 %s2327_s27, 4 }
 0x2bf   :  { %s542_s30 = scalar_lea.hbm %s2317_s1, %s855_s20 }
 0x2c0   :  { %s1638_s24 = scalar_lea.hbm %s542_s30, 16  ;;  %p1641_p13 = scmp.lt.u32.totalorder %s542_s30, %s2317_s1 }
 0x2c1   :  { %p1639_p12 = scmp.ne.s32.totalorder %s542_s30, %s1638_s24  ;;  %p1642_p0 = scmp.lt.u32.totalorder %s1880_s17, %s1638_s24 }
 0x2c2   :  { %p1644_p2 = scmp.lt.u32.totalorder %s1638_s24, %s542_s30 }
 0x2c3   :  { %p1643_p1 = por %p1642_p0, %p1641_p13 }
 0x2c5   :  { %p1645_p3 = por %p1644_p2, %p1643_p1 }
 0x2c7   :  { %p1646_p4 = pnand %p1645_p3, %p1639_p12 }
 0x2c9   :  { %1649 = shalt.err (!%p1646_p4)  }
 0x2ca   :  { %s1650_s2 = scalar_lea.vmem %s552_s22, 16  ;;  %p1655_p6 = scmp.lt.s32.totalorder %s552_s22, %s1875_s12 }
 0x2cb   :  { %p1651_p5 = scmp.ne.s32.totalorder %s552_s22, %s1650_s2  ;;  %p1656_p7 = scmp.lt.s32.totalorder %s1889_s7, %s1650_s2 }
 0x2cd   :  { %p1657_p8 = por %p1656_p7, %p1655_p6 }
 0x2cf   :  { %p1658_p9 = pnand %p1657_p8, %p1651_p5 }
 0x2d1   :  { %1661 = shalt.err (!%p1658_p9)  }
 0x2d2   :  { %554 = dma.hbm_to_vmem [thread:$0]  %s542_s30, 16, %s552_s22, [#allocation2 + $0xe] }
 0x2d3   :  { %1740 = dma.done.wait [#allocation2 + $0xf], 16 }
 0x2d4   :  { %1741 = vsyncadd [#allocation2 + $0xf], 4294967280  ;;  %s2328_s28 = sld [smem:[#allocation110_spill]]  ;;  %s1808_s0 = smov [#allocation5 + $0x1f]  }
 0x2d5   :  { %s567_s21 = sshll.u32 %s1808_s0, 4  ;;  %s568_s21 = int_to_ptr.vmem [resolvable:$true] %s567_s21 }
 0x2da   :  { %s856_s9 = sshll.u32 %s2328_s28, 4 }
 0x2db   :  { %s558_s5 = scalar_lea.hbm %s2317_s1, %s856_s9 }
 0x2dc   :  { %s1662_s13 = scalar_lea.hbm %s558_s5, 16  ;;  %p1665_p12 = scmp.lt.u32.totalorder %s558_s5, %s2317_s1 }
 0x2dd   :  { %p1663_p10 = scmp.ne.s32.totalorder %s558_s5, %s1662_s13  ;;  %p1666_p13 = scmp.lt.u32.totalorder %s1880_s17, %s1662_s13 }
 0x2de   :  { %p1668_p1 = scmp.lt.u32.totalorder %s1662_s13, %s558_s5 }
 0x2df   :  { %p1667_p0 = por %p1666_p13, %p1665_p12 }
 0x2e1   :  { %p1669_p2 = por %p1668_p1, %p1667_p0 }
 0x2e3   :  { %p1670_p3 = pnand %p1669_p2, %p1663_p10 }
 0x2e5   :  { %1673 = shalt.err (!%p1670_p3)  }
 0x2e6   :  { %s1674_s29 = scalar_lea.vmem %s568_s21, 16  ;;  %p1679_p5 = scmp.lt.s32.totalorder %s568_s21, %s1875_s12 }
 0x2e7   :  { %p1675_p4 = scmp.ne.s32.totalorder %s568_s21, %s1674_s29  ;;  %p1680_p6 = scmp.lt.s32.totalorder %s1889_s7, %s1674_s29 }
 0x2e9   :  { %p1681_p7 = por %p1680_p6, %p1679_p5 }
 0x2eb   :  { %p1682_p8 = pnand %p1681_p7, %p1675_p4 }
 0x2ed   :  { %1685 = shalt.err (!%p1682_p8)  }
 0x2ee   :  { %570 = dma.hbm_to_vmem [thread:$0]  %s558_s5, 16, %s568_s21, [#allocation2 + $0xf] }
 0x2ef   :  { %1742 = dma.done.wait [#allocation2], 16 }
 0x2f0   :  { %1743 = vsyncadd [#allocation2], 4294967280 }
 0x2f1   :  { %1744 = dma.done.wait [#allocation2 + $0x1], 16 }
 0x2f2   :  { %1745 = vsyncadd [#allocation2 + $0x1], 4294967280 }
 0x2f3   :  { %1746 = dma.done.wait [#allocation2 + $0x2], 16 }
 0x2f4   :  { %1747 = vsyncadd [#allocation2 + $0x2], 4294967280 }
 0x2f5   :  { %1748 = dma.done.wait [#allocation2 + $0x3], 16 }
 0x2f6   :  { %1749 = vsyncadd [#allocation2 + $0x3], 4294967280 }
 0x2f7   :  { %1750 = dma.done.wait [#allocation2 + $0x4], 16 }
 0x2f8   :  { %1751 = vsyncadd [#allocation2 + $0x4], 4294967280 }
 0x2f9   :  { %1752 = dma.done.wait [#allocation2 + $0x5], 16 }
 0x2fa   :  { %1753 = vsyncadd [#allocation2 + $0x5], 4294967280 }
 0x2fb   :  { %1754 = dma.done.wait [#allocation2 + $0x6], 16 }
 0x2fc   :  { %1755 = vsyncadd [#allocation2 + $0x6], 4294967280 }
 0x2fd   :  { %1756 = dma.done.wait [#allocation2 + $0x7], 16 }
 0x2fe   :  { %1757 = vsyncadd [#allocation2 + $0x7], 4294967280 }
 0x2ff   :  { %1758 = dma.done.wait [#allocation2 + $0x8], 16 }
 0x300   :  { %1759 = vsyncadd [#allocation2 + $0x8], 4294967280 }
 0x301   :  { %1760 = dma.done.wait [#allocation2 + $0x9], 16 }
 0x302   :  { %1761 = vsyncadd [#allocation2 + $0x9], 4294967280 }
 0x303   :  { %1762 = dma.done.wait [#allocation2 + $0xa], 16 }
 0x304   :  { %1763 = vsyncadd [#allocation2 + $0xa], 4294967280 }
 0x305   :  { %1764 = dma.done.wait [#allocation2 + $0xb], 16 }
 0x306   :  { %1765 = vsyncadd [#allocation2 + $0xb], 4294967280 }
 0x307   :  { %1766 = dma.done.wait [#allocation2 + $0xc], 16 }
 0x308   :  { %1767 = vsyncadd [#allocation2 + $0xc], 4294967280 }
 0x309   :  { %1768 = dma.done.wait [#allocation2 + $0xd], 16 }
 0x30a   :  { %1769 = vsyncadd [#allocation2 + $0xd], 4294967280 }
 0x30b   :  { %1770 = dma.done.wait [#allocation2 + $0xe], 16 }
 0x30c   :  { %1771 = vsyncadd [#allocation2 + $0xe], 4294967280 }
 0x30d   :  { %1772 = dma.done.wait [#allocation2 + $0xf], 16 }
 0x30e   :  { %1773 = vsyncadd [#allocation2 + $0xf], 4294967280  ;;  %p1687_p9 = scmp.ne.s32.totalorder %s1875_s12, %s1889_s7  ;;  %p1692_p10 = scmp.lt.s32.totalorder %s1889_s7, %s1889_s7 }
 0x310   :  { %p1693_p12 = por %p1692_p10, %p935_p11 }
 0x312   :  { %p1694_p13 = pnand %p1693_p12, %p1687_p9 }
 0x314   :  { %1697 = shalt.err (!%p1694_p13)
}
 0x315   :  { %s2329_s10 = sld [smem:[#allocation111_spill]] }
 0x31b   :  { %s1698_s4 = scalar_lea.hbm %s2329_s10, 512 }
 0x31c   :  { %p1699_p0 = scmp.ne.s32.totalorder %s2329_s10, %s1698_s4  ;;  %p1702_p1 = scmp.lt.u32.totalorder %s1698_s4, %s2329_s10 }
 0x31e   :  { %p1704_p2 = pnand %p1702_p1, %p1699_p0 }
 0x320   :  { %1707 = shalt.err (!%p1704_p2)
}
 0x321   :  { %s1809_s20 = smov 128   ;;  %s1810_s7 = smov 8  }
 0x322   :  { %614 = dma.vmem_to_hbm [thread:$0]  %s1875_s12, 512, %s2329_s10, [#allocation6], %s1809_s20, %s1809_s20, %s1810_s7  }
 0x323   :  { %1774 = dma.done.wait [#allocation6], 512  }
 0x324   :  { %1775 = vsyncadd [#allocation6], 4294966784 }
 0x325   :  { %618 = vsyncpa [#allocation6], 1 }
 0x326   :  { %619 = vsyncmov [#allocation2] }
 0x329   :  { %s620_s30 = vpop.sfrf %619 }
 0x32a   :  { %p857_p11 = scmp.ne.s32.totalorder %s620_s30, 0 }
 0x32c   :  { %624 = shalt.err (%p857_p11)  }
 0x32d   :  { %626 = vsyncmov [#allocation2 + $0x1] }
 0x330   :  { %s627_s26 = vpop.sfrf %626 }
 0x331   :  { %p858_p3 = scmp.ne.s32.totalorder %s627_s26, 0 }
 0x333   :  { %631 = shalt.err (%p858_p3)  }
 0x334   :  { %633 = vsyncmov [#allocation2 + $0x2] }
 0x337   :  { %s634_s22 = vpop.sfrf %633 }
 0x338   :  { %p859_p4 = scmp.ne.s32.totalorder %s634_s22, 0 }
 0x33a   :  { %638 = shalt.err (%p859_p4)  }
 0x33b   :  { %640 = vsyncmov [#allocation2 + $0x3] }
 0x33e   :  { %s641_s24 = vpop.sfrf %640 }
 0x33f   :  { %p860_p5 = scmp.ne.s32.totalorder %s641_s24, 0 }
 0x341   :  { %645 = shalt.err (%p860_p5)  }
 0x342   :  { %647 = vsyncmov [#allocation2 + $0x4] }
 0x345   :  { %s648_s12 = vpop.sfrf %647 }
 0x346   :  { %p861_p6 = scmp.ne.s32.totalorder %s648_s12, 0 }
 0x348   :  { %652 = shalt.err (%p861_p6)  }
 0x349   :  { %654 = vsyncmov [#allocation2 + $0x5] }
 0x34c   :  { %s655_s14 = vpop.sfrf %654 }
 0x34d   :  { %p862_p7 = scmp.ne.s32.totalorder %s655_s14, 0 }
 0x34f   :  { %659 = shalt.err (%p862_p7)  }
 0x350   :  { %661 = vsyncmov [#allocation2 + $0x6] }
 0x353   :  { %s662_s3 = vpop.sfrf %661 }
 0x354   :  { %p863_p8 = scmp.ne.s32.totalorder %s662_s3, 0 }
 0x356   :  { %666 = shalt.err (%p863_p8)  }
 0x357   :  { %668 = vsyncmov [#allocation2 + $0x7] }
 0x35a   :  { %s669_s2 = vpop.sfrf %668 }
 0x35b   :  { %p864_p9 = scmp.ne.s32.totalorder %s669_s2, 0 }
 0x35d   :  { %673 = shalt.err (%p864_p9)  }
 0x35e   :  { %675 = vsyncmov [#allocation2 + $0x8] }
 0x361   :  { %s676_s28 = vpop.sfrf %675 }
 0x362   :  { %p865_p10 = scmp.ne.s32.totalorder %s676_s28, 0 }
 0x364   :  { %680 = shalt.err (%p865_p10)  }
 0x365   :  { %682 = vsyncmov [#allocation2 + $0x9] }
 0x368   :  { %s683_s9 = vpop.sfrf %682 }
 0x369   :  { %p866_p12 = scmp.ne.s32.totalorder %s683_s9, 0 }
 0x36b   :  { %687 = shalt.err (%p866_p12)  }
 0x36c   :  { %689 = vsyncmov [#allocation2 + $0xa] }
 0x36f   :  { %s690_s6 = vpop.sfrf %689 }
 0x370   :  { %p867_p13 = scmp.ne.s32.totalorder %s690_s6, 0 }
 0x372   :  { %694 = shalt.err (%p867_p13)  }
 0x373   :  { %696 = vsyncmov [#allocation2 + $0xb] }
 0x376   :  { %s697_s15 = vpop.sfrf %696 }
 0x377   :  { %p868_p0 = scmp.ne.s32.totalorder %s697_s15, 0 }
 0x379   :  { %701 = shalt.err (%p868_p0)  }
 0x37a   :  { %703 = vsyncmov [#allocation2 + $0xc] }
 0x37d   :  { %s704_s5 = vpop.sfrf %703 }
 0x37e   :  { %p869_p1 = scmp.ne.s32.totalorder %s704_s5, 0 }
 0x380   :  { %708 = shalt.err (%p869_p1)  }
 0x381   :  { %710 = vsyncmov [#allocation2 + $0xd] }
 0x384   :  { %s711_s0 = vpop.sfrf %710 }
 0x385   :  { %p870_p2 = scmp.ne.s32.totalorder %s711_s0, 0 }
 0x387   :  { %715 = shalt.err (%p870_p2)  }
 0x388   :  { %717 = vsyncmov [#allocation2 + $0xe] }
 0x38b   :  { %s718_s21 = vpop.sfrf %717 }
 0x38c   :  { %p871_p11 = scmp.ne.s32.totalorder %s718_s21, 0 }
 0x38e   :  { %722 = shalt.err (%p871_p11)  }
 0x38f   :  { %724 = vsyncmov [#allocation2 + $0xf] }
 0x392   :  { %s725_s13 = vpop.sfrf %724 }
 0x393   :  { %p872_p3 = scmp.ne.s32.totalorder %s725_s13, 0 }
 0x395   :  { %729 = shalt.err (%p872_p3)  }

</bundles_post_ra>
